<compile_context>
chip_gen: v7x
topology: tpu7x:2x2x1
jax: 0.10.0
libtpu: 0.0.40
codegen_flags: <defaults>
</compile_context>

<pallas_src>
import functools

import jax
import jax.numpy as jnp
from jax.experimental import pallas as pl
from jax.experimental.pallas import tpu as pltpu

_LANES = 128
_TARGET_BLOCK_BYTES = 8 * 1024 * 1024     # ~8 MiB/block: per-step overhead <~5% even on v7x HBM
_VMEM_LIMIT_CAP = 48 * 1024 * 1024        # never ask for more than 48 MiB (< v7x 64 MiB physical)
_SMALL_FALLBACK_BYTES = 512 * 1024        # below this, a Pallas launch is pure overhead
_MIN_BLOCKS = 4                           # enough grid steps for read/compute/write overlap


def _squareplus_kernel(x_ref, o_ref, *, positive_beta, eff_shift):
    # Upcast to f32: zero wall-clock cost (HBM-bound kernel) and avoids f16 overflow
    # of x*x as well as bf16 precision loss in x*x + shift.
    x = x_ref[...].astype(jnp.float32)
    s = jnp.sqrt(x * x + eff_shift)
    if positive_beta:
        o_ref[...] = (0.5 * (x + s)).astype(o_ref.dtype)
    else:
        o_ref[...] = (0.5 * (x - s)).astype(o_ref.dtype)


def _squareplus_jnp(x, beta, shift):
    """Plain-jnp fallback (small tensors / unaligned tail). Same folded formula."""
    eff_shift = shift / (beta * beta)
    xf = x.astype(jnp.float32)
    s = jnp.sqrt(xf * xf + eff_shift)
    out = 0.5 * (xf + s) if beta > 0.0 else 0.5 * (xf - s)
    return out.astype(x.dtype)


def _choose_tile_rows(rows, sub, itemsize):
    """Pick a sublane-aligned tile height: big blocks, >= _MIN_BLOCKS steps, even count."""
    target = _TARGET_BLOCK_BYTES // (_LANES * itemsize)
    tile = max(sub, (target // sub) * sub)
    # At least _MIN_BLOCKS grid steps so the double-buffer pipeline overlaps DMA/compute.
    cap = max(sub, ((rows // _MIN_BLOCKS) // sub) * sub)
    tile = min(tile, cap)
    if tile >= rows:
        return rows
    # Prefer an even block count so v7x's two TensorCores get balanced halves.
    nblocks = pl.cdiv(rows, tile)
    if nblocks % 2 == 1:
        alt = max(sub, ((pl.cdiv(rows, nblocks + 1) + sub - 1) // sub) * sub)
        if alt < rows and pl.cdiv(rows, alt) % 2 == 0:
            tile = alt
    return tile


def squareplus(x: jax.Array, beta: float = 1.0, shift: float = 4.0) -> jax.Array:
    """Squareplus activation. Elementwise; accepts any shape (e.g. NCHW)."""
    orig_shape = x.shape
    dtype = x.dtype
    n = x.size
    if n == 0:
        return x

    beta = float(beta)
    shift = float(shift)

    if beta == 0.0:
        # Degenerate case: match the literal torch formula (1/(2*0) -> inf).
        xf = x.astype(jnp.float32) * beta
        return ((jnp.float32(0.5) / beta) * (xf + jnp.sqrt(xf * xf + shift))).astype(dtype)

    itemsize = jnp.dtype(dtype).itemsize
    if n * itemsize < _SMALL_FALLBACK_BYTES:
        # Tiny activation: one-block Pallas launch is pure dispatch/DMA overhead;
        # XLA's fused elementwise op is already at the roofline here.
        return _squareplus_jnp(x, beta, shift)

    # dtype-aware minimum sublane multiple: 8 (f32), 16 (bf16/f16), 32 (int8/fp8)
    sub = max(8, 32 // itemsize)

    x_flat = x.reshape(-1)
    main = (n // _LANES) * _LANES      # prefix that reshapes cleanly to (rows, 128)
    tail = n - main                    # < 128 leftover elements

    rows = main // _LANES
    # Aligned case: pure reshape (no copy). Unaligned: slice only the prefix.
    x2d = (x_flat if tail == 0 else x_flat[:main]).reshape(rows, _LANES)

    tile_rows = _choose_tile_rows(rows, sub, itemsize)
    grid = (pl.cdiv(rows, tile_rows),)

    block_bytes = tile_rows * _LANES * itemsize
    vmem_limit = min(_VMEM_LIMIT_CAP, max(16 << 20, 4 * block_bytes + (4 << 20)))

    kernel = functools.partial(
        _squareplus_kernel,
        positive_beta=(beta > 0.0),
        eff_shift=shift / (beta * beta),   # fold beta into the shift constant
    )

    out2d = pl.pallas_call(
        kernel,
        out_shape=jax.ShapeDtypeStruct((rows, _LANES), dtype),
        grid_spec=pltpu.PrefetchScalarGridSpec(
            num_scalar_prefetch=0,
            grid=grid,
            in_specs=[pl.BlockSpec((tile_rows, _LANES), lambda i: (i, 0))],
            out_specs=pl.BlockSpec((tile_rows, _LANES), lambda i: (i, 0)),
        ),
        compiler_params=pltpu.CompilerParams(
            dimension_semantics=("parallel",),
            vmem_limit_bytes=vmem_limit,
        ),
    )(x2d)

    out_main = out2d.reshape(-1)
    if tail == 0:
        return out_main.reshape(orig_shape)

    # TODO(synk): unaligned path pays an input slice + output concatenate copy; if
    # unaligned sizes become common, move the tail into the kernel via an overlapping
    # pl.Element final block instead of wrapper-side slice/concat.
    out_tail = _squareplus_jnp(x_flat[main:], beta, shift)
    return jnp.concatenate([out_main, out_tail]).reshape(orig_shape)


def squareplus_ref(x, beta=1.0, shift=4.0):
    """Literal reference formula (matches the PyTorch module), computed in f32."""
    xf = x.astype(jnp.float32)
    xb = xf * beta
    return 1.0 / (2.0 * beta) * (xb + jnp.sqrt(xb * xb + shift))


if __name__ == "__main__":
    key = jax.random.PRNGKey(0)
    shift = 4.0

    # Test 1: module-sized NCHW input (2,4,16,16) = 8 KiB -> small-input jnp path.
    x = jax.random.normal(key, (2, 4, 16, 16), dtype=jnp.float32)
    out = jax.block_until_ready(squareplus(x, beta=1.0, shift=shift))
    ref = squareplus_ref(x, beta=1.0, shift=shift)
    assert out.shape == x.shape and out.dtype == x.dtype
    assert jnp.allclose(out, ref, atol=1e-5, rtol=1e-5)

    # Test 2: larger NCHW tensor (1 MiB f32) -> Pallas path, 4-block pipelined grid.
    k1, k2, k3 = jax.random.split(jax.random.PRNGKey(1), 3)
    xl = jax.random.normal(k1, (2, 32, 64, 64), dtype=jnp.float32)
    outl = jax.block_until_ready(squareplus(xl, beta=1.0, shift=shift))
    refl = squareplus_ref(xl, beta=1.0, shift=shift)
    assert outl.shape == xl.shape and outl.dtype == xl.dtype
    assert jnp.allclose(outl, refl, atol=1e-5, rtol=1e-5)

    # Test 3: bf16 input -> Pallas path with in-kernel f32 upcast, non-default beta.
    xb = jax.random.normal(k2, (2, 32, 64, 64), dtype=jnp.bfloat16)
    outb = jax.block_until_ready(squareplus(xb, beta=2.0, shift=shift))
    refb = squareplus_ref(xb, beta=2.0, shift=shift)
    assert outb.shape == xb.shape and outb.dtype == xb.dtype
    assert jnp.allclose(outb.astype(jnp.float32), refb, atol=1e-2, rtol=2e-2)

    # Test 4: unaligned element count (>512 KiB) -> Pallas prefix + jnp tail path.
    xu = jax.random.normal(k3, (37, 59, 61), dtype=jnp.float32)
    outu = jax.block_until_ready(squareplus(xu, beta=2.0, shift=shift))
    refu = squareplus_ref(xu, beta=2.0, shift=shift)
    assert outu.shape == xu.shape and outu.dtype == xu.dtype
    assert jnp.allclose(outu, refu, atol=1e-5, rtol=1e-5)

    print("KERNEL_OK")
</pallas_src>

<mosaic_0001>
module attributes {stable_mosaic.version = 11 : i64} {
  func.func @_squareplus_kernel(%arg0: i32, %arg1: memref<512x128xf32, #tpu.memory_space<vmem>>, %arg2: memref<512x128xf32, #tpu.memory_space<vmem>>) attributes {dimension_semantics = [#tpu.dimension_semantics<parallel>], iteration_bounds = array<i64: 4>, scalar_prefetch = 0 : i64, scratch_operands = 0 : i64, tpu.core_type = #tpu.core_type<tc>, window_params = [{transform_indices = @transform_0, window_bounds = array<i64: 512, 128>}, {transform_indices = @transform_1, window_bounds = array<i64: 512, 128>}]} {
    %c0 = arith.constant 0 : index
    %c0_0 = arith.constant 0 : index
    %0 = vector.load %arg1[%c0, %c0_0] : memref<512x128xf32, #tpu.memory_space<vmem>>, vector<512x128xf32>
    %1 = arith.mulf %0, %0 : vector<512x128xf32>
    %cst = arith.constant 4.000000e+00 : f32
    %2 = vector.broadcast %cst : f32 to vector<512x128xf32>
    %3 = arith.addf %1, %2 : vector<512x128xf32>
    %4 = math.sqrt %3 : vector<512x128xf32>
    %5 = arith.addf %0, %4 : vector<512x128xf32>
    %cst_1 = arith.constant 5.000000e-01 : f32
    %6 = vector.broadcast %cst_1 : f32 to vector<512x128xf32>
    %7 = arith.mulf %6, %5 : vector<512x128xf32>
    %c0_2 = arith.constant 0 : index
    %c0_3 = arith.constant 0 : index
    %8 = vector.load %arg2[%c0_2, %c0_3] : memref<512x128xf32, #tpu.memory_space<vmem>>, vector<512x128xf32>
    tpu.vector_store %arg2[%c0_2, %c0_3], %7 {strides = array<i32>} : memref<512x128xf32, #tpu.memory_space<vmem>>, vector<512x128xf32>,
    return
  }
  func.func @transform_0(%arg0: i32) -> (i32, i32) {
    %c0_i32 = arith.constant 0 : i32
    %c0_i32_0 = arith.constant 0 : i32
    return %arg0, %c0_i32 : i32, i32
  }
  func.func @transform_1(%arg0: i32) -> (i32, i32) {
    %c0_i32 = arith.constant 0 : i32
    %c0_i32_0 = arith.constant 0 : i32
    return %arg0, %c0_i32 : i32, i32
  }
}

</mosaic_0001>

<bundles_post_ra>
// kernel: tpu_custom_call.1
= control target key start
LH: loop header
LB: loop body
LE: loop exit
PB: predicated region body
PF: predicated region fallthrough
CT: control target
= control target key end

     0   :  { %6 = vsyncpa [#allocation3], 0  ;;  %s2715_s0 = inlined_call_operand.hbm [shape: f32[2048,128], index: 0, kind: input, shape index: {}]   ;;  %s2716_s1 = inlined_call_operand.hbm [shape: f32[2048,128], index: 1, kind: output, shape index: {}]  }
   0x1   :  { %8 = vsyncpa [#allocation3 + $0x1], 0 }
   0x2   :  { %9 = vsyncpa [#allocation4], 0 }
   0x3   :  { %11 = vsyncpa [#allocation4 + $0x1], 0  ;;  %s1364_s6 = smov 0   ;;  %s1366_s7 = smov 0  }
   0x4   :  { %s1368_s8 = smov 0   ;;  %s1370_s9 = smov 0  }
   0x5 LB: > { %s1385_s10 = sadd.s32 4294967295, %s1346_s9   ;;  %s1056_s11 = sadd.s32 4294967294, %s1346_s9   ;;  %s1346_s9 = sphi %s1370_s9, %s2729_s9   ;;  %s1342_s8 = sphi %s1368_s8, %s2728_s8   ;;  %s1338_s7 = sphi %s1366_s7, %s2727_s7   ;;  %s1334_s6 = sphi %s1364_s6, %s2726_s6  }
   0x6   : > { %s1389_s12 = sadd.s32 1, %s1346_s9   ;;  %s24_s13 = sadd.s32 1, %s1342_s8 }
   0x7   : > { %s21_s14 = ssub.s32 %s1346_s9, %s1389_s12  ;;  %p31_p0 = scmp.ne.s32.totalorder %s1342_s8, %s1338_s7 }
   0x8   : > { %p22_p1 = scmp.eq.s32.totalorder %s21_s14, 0  ;;  %p32_p2 = scmp.eq.s32.totalorder %s1346_s9, 0 }
   0x9   : > { %p37_p3 = scmp.ne.s32.totalorder %s1338_s7, %s1334_s6  ;;  %p38_p4 = scmp.eq.s32.totalorder %s1385_s10, 0 }
   0xa   : > { %s1401_s15 = scalar_select %p22_p1, %s1342_s8, %s24_s13  }
   0xb   : > { %p1403_p5 = por %p32_p2, %p31_p0  ;;  %p1407_p6 = por %p38_p4, %p37_p3 }
   0xc   : > { %p61_p7 = scmp.eq.s32.totalorder %s1385_s10, 3  ;;  %p67_p8 = scmp.eq.s32.totalorder %s1056_s11, 3 }
   0xd   : > { %p1084_p9 = scmp.lt.s32.totalorder %s1346_s9, 4  ;;  %s87_s20 = sand.u32 1, %s1342_s8  }
   0xe   : > { %p1413_p10 = por %p61_p7, %p31_p0  ;;  %p1417_p11 = por %p67_p8, %p37_p3 }
   0xf   : > { %s1070_s21 = sshll.u32 %s1346_s9, 13  ;;  %s1059_s22 = sshll.u32 %s87_s20, 9 }
  0x10   : > { %s2720_s18 = scalar_select %p1413_p10, 1, 0 }
  0x11   : > { %s2721_s19 = scalar_select %p1417_p11, 1, 0 }
  0x12   : > { %s1426_s25 = scalar_lea.hbm %s2715_s0, %s1070_s21  ;;  %s91_s26 = scalar_lea.vmem [#allocation2], %s1059_s22 }
  0x13   : > { %s98_s27 = sshll.u32 %s91_s26, 4  ;;  %p1430_p12 = pnand %p1084_p9, %p1403_p5  ;;  %s1434_s27 = int_to_ptr.vmem [resolvable:$true] %s98_s27 }
  0x14   : > { %s1436_s29 = scalar_lea.sflag [#allocation3], %s87_s20  ;;  %s1250_s30 = scalar_lea.hbm %s1426_s25, 8192 }
  0x15   : > { %p1251_p13 = scmp.ne.s32.totalorder %s1426_s25, %s1250_s30  ;;  %p1252_p0 = pneg %p1430_p12 }
  0x16   : > { %s1255_s4 = scalar_lea.hbm %s2715_s0, 32768  ;;  %p1256_p3 = scmp.lt.u32.totalorder %s1426_s25, %s2715_s0 }
  0x17   : > { %p1253_p1 = pnand %p1252_p0, %p1251_p13  ;;  %p1257_p4 = scmp.lt.u32.totalorder %s1255_s4, %s1250_s30 }
  0x18   : > { %p1259_p7 = scmp.lt.u32.totalorder %s1250_s30, %s1426_s25 }
  0x19   : > { %p1254_p2 = pneg %p1253_p1  ;;  %p1258_p5 = por %p1257_p4, %p1256_p3 }
  0x1b   : > { %p1260_p8 = por %p1259_p7, %p1258_p5 }
  0x1d   : > { %p1261_p9 = pnand %p1260_p8, %p1254_p2 }
  0x1f   : > { %1264 = shalt.err (!%p1261_p9)
}
  0x20   : > { %s1265_s13 = scalar_lea.vmem %s1434_s27, 8192  ;;  %s1348_s14 = smov [#allocation2]  }
  0x21   : > { %p1266_p13 = scmp.ne.s32.totalorder %s1434_s27, %s1265_s13  ;;  %s1270_s16 = sshll.u32 %s1348_s14, 4  ;;  %s1271_s16 = int_to_ptr.vmem [resolvable:$false] %s1270_s16 }
  0x22   : > { %s1272_s20 = scalar_lea.vmem %s1271_s16, 16384  ;;  %p1273_p10 = scmp.lt.s32.totalorder %s1434_s27, %s1271_s16 }
  0x23   : > { %p1268_p1 = pnand %p1266_p13, %p1252_p0  ;;  %p1274_p3 = scmp.lt.s32.totalorder %s1272_s20, %s1265_s13 }
  0x25   : > { %p1269_p11 = pneg %p1268_p1  ;;  %p1275_p4 = por %p1274_p3, %p1273_p10 }
  0x27   : > { %p1276_p5 = pnand %p1275_p4, %p1269_p11 }
  0x29   : > { %1279 = shalt.err (!%p1276_p5)
}
  0x2a   : > { %s1349_s21 = smov 128   ;;  %s1350_s22 = smov 8  }
  0x2b   : > { %1079 = dma.hbm_to_vmem [thread:$0]  (!%p1430_p12), %s1426_s25, 8192, %s1434_s27, %s1436_s29, %s1349_s21, %s1349_s21, %s1350_s22  }
  0x2c   : > { %p1062_p0 = scmp.ge.s32.totalorder %s1346_s9, 1  ;;  %p106_p2 = scmp.lt.s32.totalorder %s1346_s9, 5 }
  0x2e   : > { %p107_p7 = pnand %p1062_p0, %p106_p2 }
  0x2f   : > { %s1467_s23 = sand.u32 (!%p107_p7), 1, %s1338_s7  }
  0x30   : > { %110 = sbr.rel (%p107_p7) target bundleno = 258 (0x102), region = 24  ;;  %s1063_s24 = sshll.u32 (!%p107_p7), %s1467_s23, 9 }
  0x31   : > { %s113_s26 = scalar_lea.sflag (!%p107_p7), [#allocation3], %s1467_s23  ;;  %s1473_s30 = scalar_lea.vmem (!%p107_p7), [#allocation2], %s1063_s24 }
  0x37   : > { %1325 = dma.done.wait (%p1407_p6), %s113_s26, 8192  }
  0x38   : > { %1327 = vsyncadd (%p1407_p6), %s113_s26, 4294959104  ;;  %v1480_v0 = vld [vmem:[%s1473_s30] sm:$0xff]  ;;  %v1483_v1 = vld [vmem:[%s1473_s30 + $0x8] sm:$0xff]  ;;  %s1652_s17 = scalar_lea.vmem [#allocation5], %s1063_s24  ;;  %s1071_s25 = sshll.u32 %s1385_s10, 13 }
  0x39   : > { %v1486_v2 = vld [vmem:[%s1473_s30 + $0x10] sm:$0xff]  ;;  %v201_v3 = vmul.f32 %v1480_v0, %v1480_v0  ;;  %v202_v4 = vmul.f32 %v1483_v1, %v1483_v1  ;;  %v1495_v6 = vld [vmem:[%s1473_s30 + $0x18] sm:$0xff]  ;;  %v1498_v7 = vld [vmem:[%s1473_s30 + $0x20] sm:$0xff]  ;;  %s983_s27 = sshll.u32 %s1652_s17, 4  ;;  %s2668_s2 = scalar_lea.hbm %s2716_s1, %s1071_s25  ;;  %s2670_s27 = int_to_ptr.vmem [resolvable:$true] %s983_s27 }
  0x3a   : > { %v203_v5 = vmul.f32 %v1486_v2, %v1486_v2  ;;  %v1501_v8 = vld [vmem:[%s1473_s30 + $0x28] sm:$0xff]  ;;  %v204_v9 = vmul.f32 %v1495_v6, %v1495_v6  ;;  %v205_v10 = vmul.f32 %v1498_v7, %v1498_v7  ;;  %v1518_v16 = vld [vmem:[%s1473_s30 + $0x30] sm:$0xff]  ;;  %v1521_v17 = vld [vmem:[%s1473_s30 + $0x38] sm:$0xff]  ;;  %s970_s3 = scalar_lea.sflag [#allocation4], %s1467_s23  ;;  %s1280_s10 = scalar_lea.vmem %s2670_s27, 8192 }
  0x3b   : > { %v206_v11 = vmul.f32 %v1501_v8, %v1501_v8  ;;  %v1509_v12 = vadd.f32 4.0, %v201_v3  ;;  %v1511_v13 = vadd.f32 4.0, %v202_v4  ;;  %v207_v20 = vmul.f32 %v1518_v16, %v1518_v16  ;;  %v1540_v23 = vld [vmem:[%s1473_s30 + $0x40] sm:$0xff]  ;;  %v1543_v24 = vld [vmem:[%s1473_s30 + $0x48] sm:$0xff]  ;;  %v1550_v26 = vld [vmem:[%s1473_s30 + $0x50] sm:$0xff]  ;;  %p1281_p6 = scmp.ne.s32.totalorder %s2670_s27, %s1280_s10  ;;  %p2724_p10 = scmp.ne.s32.totalorder %s2720_s18, 0 }
  0x3c   : > { %v1513_v14 = vadd.f32 4.0, %v203_v5  ;;  %v1515_v15 = vadd.f32 4.0, %v204_v9  ;;  %v1524_v18 = vadd.f32 4.0, %v205_v10  ;;  %v208_v21 = vmul.f32 %v1521_v17, %v1521_v17  ;;  %v1558_v29 = vld [vmem:[%s1473_s30 + $0x58] sm:$0xff]  ;;  %v1561_v30 = vld [vmem:[%s1473_s30 + $0x60] sm:$0xff]  ;;  %v1573_v35 = vld [vmem:[%s1473_s30 + $0x68] sm:$0xff] }
  0x3d   : > { %1122 = vrsqrt.f32 %v1509_v12  ;;  %v1527_v19 = vadd.f32 4.0, %v206_v11  ;;  %vm331_vm0 = vcmp.eq.f32.partialorder %v1509_v12, inf  ;;  %vm333_vm1 = vcmp.eq.f32.partialorder %v1509_v12, 0.0  ;;  %p1282_p11 = pnand %p1281_p6, %p2724_p10  ;;  %s1351_s4 = smov [#allocation5]  }
  0x3e   : > { %1124 = vrsqrt.f32 %v1511_v13  ;;  %v334_v22 = vand.u32 2147483648, %v1509_v12  ;;  %vm338_vm2 = vcmp.eq.f32.partialorder %v1511_v13, inf  ;;  %vm340_vm3 = vcmp.eq.f32.partialorder %v1511_v13, 0.0  ;;  %s1284_s5 = sshll.u32 %s1351_s4, 4  ;;  %s1285_s5 = int_to_ptr.vmem [resolvable:$false] %s1284_s5 }
  0x3f   : > { %1126 = vrsqrt.f32 %v1513_v14  ;;  %v341_v25 = vand.u32 2147483648, %v1511_v13  ;;  %vm345_vm4 = vcmp.eq.f32.partialorder %v1513_v14, inf  ;;  %vm347_vm5 = vcmp.eq.f32.partialorder %v1513_v14, 0.0  ;;  %p1283_p12 = pneg %p1282_p11  ;;  %s1286_s11 = scalar_lea.vmem %s1285_s5, 16384 }
  0x40   : > { %1128 = vrsqrt.f32 %v1515_v15  ;;  %v348_v27 = vand.u32 2147483648, %v1513_v14  ;;  %vm352_vm6 = vcmp.eq.f32.partialorder %v1515_v15, inf  ;;  %v355_v28 = vand.u32 2147483648, %v1515_v15  ;;  %p1287_p8 = scmp.lt.s32.totalorder %s2670_s27, %s1285_s5  ;;  %p1288_p9 = scmp.lt.s32.totalorder %s1286_s11, %s1280_s10 }
  0x41   : > { %1130 = vrsqrt.f32 %v1524_v18  ;;  %vm354_vm7 = vcmp.eq.f32.partialorder %v1515_v15, 0.0  ;;  %v1564_v31 = vadd.f32 4.0, %v207_v20  ;;  %v1566_v32 = vadd.f32 4.0, %v208_v21 }
  0x42   : > { %1132 = vrsqrt.f32 %v1527_v19  ;;  %v209_v33 = vmul.f32 %v1540_v23, %v1540_v23  ;;  %v210_v34 = vmul.f32 %v1543_v24, %v1543_v24  ;;  %vm359_vm8 = vcmp.eq.f32.partialorder %v1524_v18, inf  ;;  %p1289_p13 = por %p1288_p9, %p1287_p8 }
  0x43   : > { %vm361_vm9 = vcmp.eq.f32.partialorder %v1524_v18, 0.0  ;;  %v362_v36 = vand.u32 2147483648, %v1524_v18  ;;  %v211_v37 = vmul.f32 %v1550_v26, %v1550_v26  ;;  %vm366_vm10 = vcmp.eq.f32.partialorder %v1527_v19, inf }
  0x44   : > { %1134 = vrsqrt.f32 %v1564_v31  ;;  %v212_v38 = vmul.f32 %v1558_v29, %v1558_v29  ;;  %v213_v39 = vmul.f32 %v1561_v30, %v1561_v30  ;;  %vm368_vm11 = vcmp.eq.f32.partialorder %v1527_v19, 0.0  ;;  %p1290_p1 = pnand %p1289_p13, %p1283_p12 }
  0x45   : > { %v369_v40 = vand.u32 2147483648, %v1527_v19  ;;  %1136 = vrsqrt.f32 %v1566_v32  ;;  %v214_v41 = vmul.f32 %v1573_v35, %v1573_v35  ;;  %vm373_vm12 = vcmp.eq.f32.partialorder %v1564_v31, inf }
  0x46   : > { %v376_v43 = vand.u32 2147483648, %v1564_v31  ;;  %v1593_v44 = vadd.f32 4.0, %v209_v33  ;;  %v1595_v45 = vadd.f32 4.0, %v210_v34  ;;  %vm375_vm13 = vcmp.eq.f32.partialorder %v1564_v31, 0.0 }
  0x47   : > { %v1123_v42 = vpop.eup %1122  ;;  %vm380_vm14 = vcmp.eq.f32.partialorder %v1566_v32, inf  ;;  %v383_v48 = vand.u32 2147483648, %v1566_v32  ;;  %v1601_v49 = vadd.f32 4.0, %v211_v37  ;;  %v1606_v52 = vadd.f32 4.0, %v212_v38 }
  0x48   : > { %v1125_v46 = vpop.eup %1124  ;;  %v330_v47 = vmul.f32 %v1123_v42, %v1509_v12  ;;  %1138 = vrsqrt.f32 %v1593_v44  ;;  %v1608_v53 = vadd.f32 4.0, %v213_v39  ;;  %v1615_v57 = vadd.f32 4.0, %v214_v41 }
  0x49   : > { %v1127_v50 = vpop.eup %1126  ;;  %v337_v51 = vmul.f32 %v1125_v46, %v1511_v13  ;;  %1140 = vrsqrt.f32 %v1595_v45  ;;  %vm387_vm15 = vcmp.eq.f32.partialorder %v1593_v44, inf }
  0x4a   : > { %v1129_v54 = vpop.eup %1128  ;;  %v332_v55 = vsel %vm331_vm0, %v1509_v12, %v330_v47  ;;  %v344_v56 = vmul.f32 %v1127_v50, %v1513_v14  ;;  %vm389_vm0 = vcmp.eq.f32.partialorder %v1593_v44, 0.0  ;;  %1142 = vrsqrt.f32 %v1601_v49 }
  0x4b   : > { %v1131_v58 = vpop.eup %1130  ;;  %v335_v59 = vsel %vm333_vm1, %v334_v22, %v332_v55  ;;  %v339_v60 = vsel %vm338_vm2, %v1511_v13, %v337_v51  ;;  %v351_v61 = vmul.f32 %v1129_v54, %v1515_v15  ;;  %vm394_vm1 = vcmp.eq.f32.partialorder %v1595_v45, inf }
  0x4c   : > { %v1133_v62 = vpop.eup %1132  ;;  %v777_v63 = vadd.f32 %v335_v59, %v1480_v0  ;;  %v342_v3 = vsel %vm340_vm3, %v341_v25, %v339_v60  ;;  %v346_v4 = vsel %vm345_vm4, %v1513_v14, %v344_v56  ;;  %v358_v5 = vmul.f32 %v1131_v58, %v1524_v18  ;;  %v1709_v59 = vld [vmem:[%s1473_s30 + $0x78] sm:$0xff]  ;;  %v1720_v60 = vld [vmem:[%s1473_s30 + $0x88] sm:$0xff] }
  0x4d   : > { %v778_v9 = vadd.f32 %v342_v3, %v1483_v1  ;;  %v349_v10 = vsel %vm347_vm5, %v348_v27, %v346_v4  ;;  %v353_v11 = vsel %vm352_vm6, %v1515_v15, %v351_v61  ;;  %v365_v0 = vmul.f32 %v1133_v62, %v1527_v19 }
  0x4e   : > { %v841_v12 = vmul.f32 0.5, %v777_v63  ;;  %v779_v13 = vadd.f32 %v349_v10, %v1486_v2  ;;  %v356_v20 = vsel %vm354_vm7, %v355_v28, %v353_v11  ;;  %v360_v21 = vsel %vm359_vm8, %v1524_v18, %v358_v5  ;;  %v1135_v1 = vpop.eup %1134  ;;  %v1726_v63 = vld [vmem:[%s1473_s30 + $0x90] sm:$0xff]  ;;  %v1738_v10 = vld [vmem:[%s1473_s30 + $0xa0] sm:$0xff] }
  0x4f   : > { %v842_v22 = vmul.f32 0.5, %v778_v9  ;;  %v780_v14 = vadd.f32 %v356_v20, %v1495_v6  ;;  %v363_v25 = vsel %vm361_vm9, %v362_v36, %v360_v21  ;;  %v367_v27 = vsel %vm366_vm10, %v1527_v19, %v365_v0  ;;  %v1137_v33 = vpop.eup %1136  ;;  %v1735_v9 = vld [vmem:[%s1473_s30 + $0x98] sm:$0xff] }
  0x50   : > { %905 = vst [vmem:[%s1652_s17] sm:$0xff] %v841_v12  ;;  %v843_v2 = vmul.f32 0.5, %v779_v13  ;;  %v781_v15 = vadd.f32 %v363_v25, %v1498_v7  ;;  %v370_v6 = vsel %vm368_vm11, %v369_v40, %v367_v27  ;;  %v372_v18 = vmul.f32 %v1135_v1, %v1564_v31 }
  0x51   : > { %906 = vst [vmem:[%s1652_s17 + $0x8] sm:$0xff] %v842_v22  ;;  %v844_v28 = vmul.f32 0.5, %v780_v14  ;;  %v782_v34 = vadd.f32 %v370_v6, %v1501_v8  ;;  %v379_v36 = vmul.f32 %v1137_v33, %v1566_v32  ;;  %v390_v19 = vand.u32 2147483648, %v1593_v44 }
  0x52   : > { %907 = vst [vmem:[%s1652_s17 + $0x10] sm:$0xff] %v843_v2  ;;  %v845_v37 = vmul.f32 0.5, %v781_v15  ;;  %v374_v7 = vsel %vm373_vm12, %v1564_v31, %v372_v18  ;;  %v1139_v38 = vpop.eup %1138  ;;  %vm2723_vm2 = vcmp.eq.f32.partialorder %v1566_v32, 0.0  ;;  %v397_v31 = vand.u32 2147483648, %v1595_v45 }
  0x53   : > { %908 = vst [vmem:[%s1652_s17 + $0x18] sm:$0xff] %v844_v28  ;;  %v846_v39 = vmul.f32 0.5, %v782_v34  ;;  %v377_v8 = vsel %vm375_vm13, %v376_v43, %v374_v7  ;;  %v381_v40 = vsel %vm380_vm14, %v1566_v32, %v379_v36  ;;  %v1141_v41 = vpop.eup %1140  ;;  %v386_v47 = vmul.f32 %v1139_v38, %v1593_v44  ;;  %v1687_v43 = vld [vmem:[%s1473_s30 + $0x70] sm:$0xff] }
  0x54   : > { %909 = vst [vmem:[%s1652_s17 + $0x20] sm:$0xff] %v845_v37  ;;  %v783_v42 = vadd.f32 %v377_v8, %v1518_v16  ;;  %v384_v46 = vsel %vm2723_vm2, %v383_v48, %v381_v40  ;;  %v393_v51 = vmul.f32 %v1141_v41, %v1595_v45  ;;  %vm396_vm3 = vcmp.eq.f32.partialorder %v1595_v45, 0.0  ;;  %v1143_v11 = vpop.eup %1142 }
  0x55   : > { %910 = vst [vmem:[%s1652_s17 + $0x28] sm:$0xff] %v846_v39  ;;  %v784_v50 = vadd.f32 %v384_v46, %v1521_v17  ;;  %1144 = vrsqrt.f32 %v1606_v52  ;;  %v388_v32 = vsel %vm387_vm15, %v1593_v44, %v386_v47  ;;  %v215_v55 = vmul.f32 %v1687_v43, %v1687_v43  ;;  %v1712_v44 = vld [vmem:[%s1473_s30 + $0x80] sm:$0xff] }
  0x56   : > { %v847_v16 = vmul.f32 0.5, %v783_v42  ;;  %v391_v54 = vsel %vm389_vm0, %v390_v19, %v388_v32  ;;  %v395_v17 = vsel %vm394_vm1, %v1595_v45, %v393_v51  ;;  %vm401_vm4 = vcmp.eq.f32.partialorder %v1601_v49, inf  ;;  %v1817_v32 = vld [vmem:[%s1473_s30 + $0xa8] sm:$0xff] }
  0x57   : > { %v848_v48 = vmul.f32 0.5, %v784_v50  ;;  %v785_v56 = vadd.f32 %v391_v54, %v1540_v23  ;;  %v398_v58 = vsel %vm396_vm3, %v397_v31, %v395_v17  ;;  %1146 = vrsqrt.f32 %v1608_v53 }
  0x58   : > { %911 = vst [vmem:[%s1652_s17 + $0x30] sm:$0xff] %v847_v16  ;;  %v786_v45 = vadd.f32 %v398_v58, %v1543_v24  ;;  %vm403_vm5 = vcmp.eq.f32.partialorder %v1601_v49, 0.0  ;;  %v404_v23 = vand.u32 2147483648, %v1601_v49  ;;  %1148 = vrsqrt.f32 %v1615_v57 }
  0x59   : > { %912 = vst [vmem:[%s1652_s17 + $0x38] sm:$0xff] %v848_v48  ;;  %v849_v61 = vmul.f32 0.5, %v785_v56  ;;  %vm408_vm6 = vcmp.eq.f32.partialorder %v1606_v52, inf  ;;  %vm410_vm7 = vcmp.eq.f32.partialorder %v1606_v52, 0.0  ;;  %v411_v62 = vand.u32 2147483648, %v1606_v52 }
  0x5a   : > { %v850_v24 = vmul.f32 0.5, %v786_v45  ;;  %v1728_v3 = vadd.f32 4.0, %v215_v55  ;;  %v216_v4 = vmul.f32 %v1709_v59, %v1709_v59  ;;  %v217_v5 = vmul.f32 %v1712_v44, %v1712_v44 }
  0x5b   : > { %913 = vst [vmem:[%s1652_s17 + $0x40] sm:$0xff] %v849_v61  ;;  %vm415_vm8 = vcmp.eq.f32.partialorder %v1608_v53, inf  ;;  %vm417_vm9 = vcmp.eq.f32.partialorder %v1608_v53, 0.0  ;;  %v418_v0 = vand.u32 2147483648, %v1608_v53  ;;  %v218_v12 = vmul.f32 %v1720_v60, %v1720_v60 }
  0x5c   : > { %914 = vst [vmem:[%s1652_s17 + $0x48] sm:$0xff] %v850_v24  ;;  %v400_v13 = vmul.f32 %v1143_v11, %v1601_v49  ;;  %vm422_vm10 = vcmp.eq.f32.partialorder %v1615_v57, inf  ;;  %1150 = vrsqrt.f32 %v1728_v3  ;;  %v219_v20 = vmul.f32 %v1726_v63, %v1726_v63 }
  0x5d   : > { %v1752_v21 = vadd.f32 4.0, %v216_v4  ;;  %v1754_v1 = vadd.f32 4.0, %v217_v5  ;;  %v220_v22 = vmul.f32 %v1735_v9, %v1735_v9  ;;  %v221_v14 = vmul.f32 %v1738_v10, %v1738_v10 }
  0x5e   : > { %v402_v27 = vsel %vm401_vm4, %v1601_v49, %v400_v13  ;;  %vm424_vm11 = vcmp.eq.f32.partialorder %v1615_v57, 0.0  ;;  %v425_v33 = vand.u32 2147483648, %v1615_v57  ;;  %v1765_v2 = vadd.f32 4.0, %v218_v12 }
  0x5f   : > { %v1145_v25 = vpop.eup %1144  ;;  %v405_v15 = vsel %vm403_vm5, %v404_v23, %v402_v27  ;;  %vm429_vm12 = vcmp.eq.f32.partialorder %v1728_v3, inf  ;;  %1152 = vrsqrt.f32 %v1752_v21  ;;  %vm431_vm13 = vcmp.eq.f32.partialorder %v1728_v3, 0.0 }
  0x60   : > { %v407_v6 = vmul.f32 %v1145_v25, %v1606_v52  ;;  %v787_v18 = vadd.f32 %v405_v15, %v1550_v26  ;;  %1154 = vrsqrt.f32 %v1754_v1  ;;  %v1775_v28 = vadd.f32 4.0, %v219_v20  ;;  %v1864_v25 = vld [vmem:[%s1473_s30 + $0xc8] sm:$0xff] }
  0x61   : > { %v1147_v34 = vpop.eup %1146  ;;  %v432_v36 = vand.u32 2147483648, %v1728_v3  ;;  %v1781_v37 = vadd.f32 4.0, %v220_v22  ;;  %v1783_v7 = vadd.f32 4.0, %v221_v14  ;;  %1156 = vrsqrt.f32 %v1765_v2 }
  0x62   : > { %v409_v49 = vsel %vm408_vm6, %v1606_v52, %v407_v6  ;;  %v1149_v19 = vpop.eup %1148  ;;  %v851_v26 = vmul.f32 0.5, %v787_v18  ;;  %v414_v39 = vmul.f32 %v1147_v34, %v1608_v53  ;;  %vm436_vm14 = vcmp.eq.f32.partialorder %v1752_v21, inf }
  0x63   : > { %v412_v38 = vsel %vm410_vm7, %v411_v62, %v409_v49  ;;  %v421_v40 = vmul.f32 %v1149_v19, %v1615_v57  ;;  %vm438_vm15 = vcmp.eq.f32.partialorder %v1752_v21, 0.0  ;;  %v439_v52 = vand.u32 2147483648, %v1752_v21 }
  0x64   : > { %v788_v8 = vadd.f32 %v412_v38, %v1558_v29  ;;  %915 = vst [vmem:[%s1652_s17 + $0x50] sm:$0xff] %v851_v26  ;;  %v416_v41 = vsel %vm415_vm8, %v1608_v53, %v414_v39  ;;  %vm443_vm0 = vcmp.eq.f32.partialorder %v1754_v1, inf  ;;  %1158 = vrsqrt.f32 %v1775_v28 }
  0x65   : > { %v419_v42 = vsel %vm417_vm9, %v418_v0, %v416_v41  ;;  %v423_v46 = vsel %vm422_vm10, %v1615_v57, %v421_v40  ;;  %vm445_vm1 = vcmp.eq.f32.partialorder %v1754_v1, 0.0  ;;  %v446_v51 = vand.u32 2147483648, %v1754_v1 }
  0x66   : > { %v852_v29 = vmul.f32 0.5, %v788_v8  ;;  %v1151_v47 = vpop.eup %1150  ;;  %v789_v31 = vadd.f32 %v419_v42, %v1561_v30  ;;  %v426_v50 = vsel %vm424_vm11, %v425_v33, %v423_v46  ;;  %1160 = vrsqrt.f32 %v1781_v37  ;;  %v1820_v30 = vld [vmem:[%s1473_s30 + $0xb0] sm:$0xff] }
  0x67   : > { %v790_v53 = vadd.f32 %v426_v50, %v1573_v35  ;;  %v428_v16 = vmul.f32 %v1151_v47, %v1728_v3  ;;  %vm450_vm2 = vcmp.eq.f32.partialorder %v1765_v2, inf  ;;  %vm452_vm3 = vcmp.eq.f32.partialorder %v1765_v2, 0.0  ;;  %v1903_v42 = vld [vmem:[%s1473_s30 + $0xd0] sm:$0xff] }
  0x68   : > { %916 = vst [vmem:[%s1652_s17 + $0x58] sm:$0xff] %v852_v29  ;;  %v853_v57 = vmul.f32 0.5, %v789_v31  ;;  %v453_v48 = vand.u32 2147483648, %v1765_v2  ;;  %vm457_vm4 = vcmp.eq.f32.partialorder %v1775_v28, inf  ;;  %1162 = vrsqrt.f32 %v1783_v7 }
  0x69   : > { %v1153_v35 = vpop.eup %1152  ;;  %v854_v54 = vmul.f32 0.5, %v790_v53  ;;  %v430_v17 = vsel %vm429_vm12, %v1728_v3, %v428_v16  ;;  %vm459_vm5 = vcmp.eq.f32.partialorder %v1775_v28, 0.0  ;;  %v460_v55 = vand.u32 2147483648, %v1775_v28  ;;  %v1844_v3 = vld [vmem:[%s1473_s30 + $0xb8] sm:$0xff] }
  0x6a   : > { %v1155_v56 = vpop.eup %1154  ;;  %917 = vst [vmem:[%s1652_s17 + $0x60] sm:$0xff] %v853_v57  ;;  %v433_v58 = vsel %vm431_vm13, %v432_v36, %v430_v17  ;;  %v435_v45 = vmul.f32 %v1153_v35, %v1752_v21  ;;  %v222_v23 = vmul.f32 %v1817_v32, %v1817_v32  ;;  %v223_v61 = vmul.f32 %v1820_v30, %v1820_v30  ;;  %v1940_v17 = vld [vmem:[%s1473_s30 + $0xe8] sm:$0xff] }
  0x6b   : > { %918 = vst [vmem:[%s1652_s17 + $0x68] sm:$0xff] %v854_v54  ;;  %v791_v62 = vadd.f32 %v433_v58, %v1687_v43  ;;  %v442_v24 = vmul.f32 %v1155_v56, %v1754_v1  ;;  %vm464_vm6 = vcmp.eq.f32.partialorder %v1781_v37, inf  ;;  %vm466_vm7 = vcmp.eq.f32.partialorder %v1781_v37, 0.0  ;;  %v1157_v4 = vpop.eup %1156  ;;  %v1855_v43 = vld [vmem:[%s1473_s30 + $0xc0] sm:$0xff] }
  0x6c   : > { %v437_v5 = vsel %vm436_vm14, %v1752_v21, %v435_v45  ;;  %v467_v11 = vand.u32 2147483648, %v1781_v37  ;;  %v1850_v0 = vadd.f32 4.0, %v222_v23  ;;  %v1852_v12 = vadd.f32 4.0, %v223_v61 }
  0x6d   : > { %v855_v13 = vmul.f32 0.5, %v791_v62  ;;  %v440_v20 = vsel %vm438_vm15, %v439_v52, %v437_v5  ;;  %v444_v22 = vsel %vm443_vm0, %v1754_v1, %v442_v24  ;;  %v449_v14 = vmul.f32 %v1157_v4, %v1765_v2 }
  0x6e   : > { %v1159_v27 = vpop.eup %1158  ;;  %v792_v33 = vadd.f32 %v440_v20, %v1709_v59  ;;  %v447_v15 = vsel %vm445_vm1, %v446_v51, %v444_v22  ;;  %1164 = vrsqrt.f32 %v1850_v0  ;;  %v224_v21 = vmul.f32 %v1844_v3, %v1844_v3 }
  0x6f   : > { %919 = vst [vmem:[%s1652_s17 + $0x70] sm:$0xff] %v855_v13  ;;  %v793_v6 = vadd.f32 %v447_v15, %v1712_v44  ;;  %v451_v18 = vsel %vm450_vm2, %v1765_v2, %v449_v14  ;;  %v456_v34 = vmul.f32 %v1159_v27, %v1775_v28  ;;  %v225_v59 = vmul.f32 %v1855_v43, %v1855_v43 }
  0x70   : > { %v1161_v1 = vpop.eup %1160  ;;  %v856_v49 = vmul.f32 0.5, %v792_v33  ;;  %v454_v36 = vsel %vm452_vm3, %v453_v48, %v451_v18  ;;  %1166 = vrsqrt.f32 %v1852_v12  ;;  %v226_v44 = vmul.f32 %v1864_v25, %v1864_v25  ;;  %v1933_v48 = vld [vmem:[%s1473_s30 + $0xe0] sm:$0xff] }
  0x71   : > { %v857_v19 = vmul.f32 0.5, %v793_v6  ;;  %v794_v26 = vadd.f32 %v454_v36, %v1720_v60  ;;  %v458_v38 = vsel %vm457_vm4, %v1775_v28, %v456_v34  ;;  %v463_v39 = vmul.f32 %v1161_v1, %v1781_v37 }
  0x72   : > { %v1163_v8 = vpop.eup %1162  ;;  %920 = vst [vmem:[%s1652_s17 + $0x78] sm:$0xff] %v856_v49  ;;  %v461_v2 = vsel %vm459_vm5, %v460_v55, %v458_v38  ;;  %vm471_vm8 = vcmp.eq.f32.partialorder %v1783_v7, inf  ;;  %vm473_vm9 = vcmp.eq.f32.partialorder %v1783_v7, 0.0  ;;  %v474_v40 = vand.u32 2147483648, %v1783_v7  ;;  %v2008_v38 = vld [vmem:[%s1473_s30 + $0xf8] sm:$0xff] }
  0x73   : > { %921 = vst [vmem:[%s1652_s17 + $0x80] sm:$0xff] %v857_v19  ;;  %v858_v60 = vmul.f32 0.5, %v794_v26  ;;  %v795_v41 = vadd.f32 %v461_v2, %v1726_v63  ;;  %v465_v52 = vsel %vm464_vm6, %v1781_v37, %v463_v39  ;;  %v470_v29 = vmul.f32 %v1163_v8, %v1783_v7  ;;  %v2011_v39 = vld [vmem:[%s1473_s30 + $0x100] sm:$0xff] }
  0x74   : > { %v468_v28 = vsel %vm466_vm7, %v467_v11, %v465_v52  ;;  %v1907_v46 = vadd.f32 4.0, %v224_v21  ;;  %v1909_v47 = vadd.f32 4.0, %v225_v59  ;;  %v1911_v31 = vadd.f32 4.0, %v226_v44 }
  0x75   : > { %922 = vst [vmem:[%s1652_s17 + $0x88] sm:$0xff] %v858_v60  ;;  %v859_v63 = vmul.f32 0.5, %v795_v41  ;;  %v796_v50 = vadd.f32 %v468_v28, %v1735_v9  ;;  %v472_v51 = vsel %vm471_vm8, %v1783_v7, %v470_v29  ;;  %vm478_vm10 = vcmp.eq.f32.partialorder %v1850_v0, inf  ;;  %v1930_v7 = vld [vmem:[%s1473_s30 + $0xd8] sm:$0xff] }
  0x76   : > { %v475_v37 = vsel %vm473_vm9, %v474_v40, %v472_v51  ;;  %vm480_vm11 = vcmp.eq.f32.partialorder %v1850_v0, 0.0  ;;  %1168 = vrsqrt.f32 %v1907_v46  ;;  %v227_v53 = vmul.f32 %v1903_v42, %v1903_v42  ;;  %v2021_v40 = vld [vmem:[%s1473_s30 + $0x108] sm:$0xff] }
  0x77   : > { %923 = vst [vmem:[%s1652_s17 + $0x90] sm:$0xff] %v859_v63  ;;  %v860_v9 = vmul.f32 0.5, %v796_v50  ;;  %v797_v16 = vadd.f32 %v475_v37, %v1738_v10  ;;  %v481_v57 = vand.u32 2147483648, %v1850_v0  ;;  %1170 = vrsqrt.f32 %v1909_v47  ;;  %v1943_v10 = vld [vmem:[%s1473_s30 + $0xf0] sm:$0xff] }
  0x78   : > { %v1165_v35 = vpop.eup %1164  ;;  %vm485_vm12 = vcmp.eq.f32.partialorder %v1852_v12, inf  ;;  %vm487_vm13 = vcmp.eq.f32.partialorder %v1852_v12, 0.0  ;;  %v488_v54 = vand.u32 2147483648, %v1852_v12  ;;  %1172 = vrsqrt.f32 %v1911_v31 }
  0x79   : > { %924 = vst [vmem:[%s1652_s17 + $0x98] sm:$0xff] %v860_v9  ;;  %v861_v55 = vmul.f32 0.5, %v797_v16  ;;  %v477_v56 = vmul.f32 %v1165_v35, %v1850_v0  ;;  %vm492_vm14 = vcmp.eq.f32.partialorder %v1907_v46, inf  ;;  %vm494_vm15 = vcmp.eq.f32.partialorder %v1907_v46, 0.0 }
  0x7a   : > { %v1167_v58 = vpop.eup %1166  ;;  %v495_v45 = vand.u32 2147483648, %v1907_v46  ;;  %v1950_v23 = vadd.f32 4.0, %v227_v53  ;;  %v228_v61 = vmul.f32 %v1930_v7, %v1930_v7  ;;  %v229_v62 = vmul.f32 %v1933_v48, %v1933_v48 }
  0x7b   : > { %925 = vst [vmem:[%s1652_s17 + $0xa0] sm:$0xff] %v861_v55  ;;  %v479_v24 = vsel %vm478_vm10, %v1850_v0, %v477_v56  ;;  %v484_v4 = vmul.f32 %v1167_v58, %v1852_v12  ;;  %v230_v5 = vmul.f32 %v1940_v17, %v1940_v17  ;;  %v231_v11 = vmul.f32 %v1943_v10, %v1943_v10 }
  0x7c   : > { %v482_v13 = vsel %vm480_vm11, %v481_v57, %v479_v24  ;;  %vm499_vm0 = vcmp.eq.f32.partialorder %v1909_v47, inf  ;;  %vm501_vm1 = vcmp.eq.f32.partialorder %v1909_v47, 0.0  ;;  %1174 = vrsqrt.f32 %v1950_v23  ;;  %v2068_v24 = vld [vmem:[%s1473_s30 + $0x118] sm:$0xff] }
  0x7d   : > { %v798_v20 = vadd.f32 %v482_v13, %v1817_v32  ;;  %v486_v22 = vsel %vm485_vm12, %v1852_v12, %v484_v4  ;;  %v502_v14 = vand.u32 2147483648, %v1909_v47  ;;  %v1975_v27 = vadd.f32 4.0, %v228_v61 }
  0x7e   : > { %v489_v0 = vsel %vm487_vm13, %v488_v54, %v486_v22  ;;  %vm506_vm2 = vcmp.eq.f32.partialorder %v1911_v31, inf  ;;  %v1980_v33 = vadd.f32 4.0, %v229_v62  ;;  %v1982_v15 = vadd.f32 4.0, %v230_v5  ;;  %v2053_v54 = vld [vmem:[%s1473_s30 + $0x110] sm:$0xff] }
  0x7f   : > { %v862_v21 = vmul.f32 0.5, %v798_v20  ;;  %v799_v32 = vadd.f32 %v489_v0, %v1820_v30  ;;  %1176 = vrsqrt.f32 %v1975_v27  ;;  %v1986_v6 = vadd.f32 4.0, %v231_v11 }
  0x80   : > { %v1169_v18 = vpop.eup %1168  ;;  %vm508_vm3 = vcmp.eq.f32.partialorder %v1911_v31, 0.0  ;;  %v509_v12 = vand.u32 2147483648, %v1911_v31  ;;  %vm513_vm4 = vcmp.eq.f32.partialorder %v1950_v23, inf  ;;  %1178 = vrsqrt.f32 %v1980_v33 }
  0x81   : > { %v1171_v34 = vpop.eup %1170  ;;  %926 = vst [vmem:[%s1652_s17 + $0xa8] sm:$0xff] %v862_v21  ;;  %v863_v59 = vmul.f32 0.5, %v799_v32  ;;  %v491_v30 = vmul.f32 %v1169_v18, %v1907_v46  ;;  %vm515_vm5 = vcmp.eq.f32.partialorder %v1950_v23, 0.0  ;;  %v516_v1 = vand.u32 2147483648, %v1950_v23 }
  0x82   : > { %v1173_v49 = vpop.eup %1172  ;;  %v498_v36 = vmul.f32 %v1171_v34, %v1909_v47  ;;  %vm520_vm6 = vcmp.eq.f32.partialorder %v1975_v27, inf  ;;  %vm522_vm7 = vcmp.eq.f32.partialorder %v1975_v27, 0.0  ;;  %1180 = vrsqrt.f32 %v1982_v15  ;;  %v2096_v34 = vld [vmem:[%s1473_s30 + $0x120] sm:$0xff] }
  0x83   : > { %927 = vst [vmem:[%s1652_s17 + $0xb0] sm:$0xff] %v863_v59  ;;  %v493_v44 = vsel %vm492_vm14, %v1907_v46, %v491_v30  ;;  %v505_v19 = vmul.f32 %v1173_v49, %v1911_v31  ;;  %v523_v26 = vand.u32 2147483648, %v1975_v27  ;;  %1182 = vrsqrt.f32 %v1986_v6  ;;  %v2108_v30 = vld [vmem:[%s1473_s30 + $0x130] sm:$0xff] }
  0x84   : > { %v496_v8 = vsel %vm494_vm15, %v495_v45, %v493_v44  ;;  %v500_v2 = vsel %vm499_vm0, %v1909_v47, %v498_v36  ;;  %vm527_vm8 = vcmp.eq.f32.partialorder %v1980_v33, inf  ;;  %vm529_vm9 = vcmp.eq.f32.partialorder %v1980_v33, 0.0 }
  0x85   : > { %v800_v60 = vadd.f32 %v496_v8, %v1844_v3  ;;  %v503_v41 = vsel %vm501_vm1, %v502_v14, %v500_v2  ;;  %v507_v52 = vsel %vm506_vm2, %v1911_v31, %v505_v19  ;;  %v530_v29 = vand.u32 2147483648, %v1980_v33  ;;  %v2123_v8 = vld [vmem:[%s1473_s30 + $0x138] sm:$0xff] }
  0x86   : > { %v1175_v28 = vpop.eup %1174  ;;  %v801_v46 = vadd.f32 %v503_v41, %v1855_v43  ;;  %v510_v63 = vsel %vm508_vm3, %v509_v12, %v507_v52  ;;  %v232_v50 = vmul.f32 %v2008_v38, %v2008_v38  ;;  %v233_v3 = vmul.f32 %v2011_v39, %v2011_v39 }
  0x87   : > { %v864_v47 = vmul.f32 0.5, %v800_v60  ;;  %v802_v51 = vadd.f32 %v510_v63, %v1864_v25  ;;  %v512_v37 = vmul.f32 %v1175_v28, %v1950_v23  ;;  %v234_v53 = vmul.f32 %v2021_v40, %v2021_v40 }
  0x88   : > { %v865_v43 = vmul.f32 0.5, %v801_v46  ;;  %vm534_vm10 = vcmp.eq.f32.partialorder %v1982_v15, inf  ;;  %v2042_v31 = vadd.f32 4.0, %v232_v50  ;;  %v2044_v9 = vadd.f32 4.0, %v233_v3 }
  0x89   : > { %v1177_v16 = vpop.eup %1176  ;;  %928 = vst [vmem:[%s1652_s17 + $0xb8] sm:$0xff] %v864_v47  ;;  %v866_v57 = vmul.f32 0.5, %v802_v51  ;;  %v514_v25 = vsel %vm513_vm4, %v1950_v23, %v512_v37  ;;  %vm536_vm11 = vcmp.eq.f32.partialorder %v1982_v15, 0.0  ;;  %v537_v35 = vand.u32 2147483648, %v1982_v15 }
  0x8a   : > { %v1179_v55 = vpop.eup %1178  ;;  %929 = vst [vmem:[%s1652_s17 + $0xc0] sm:$0xff] %v865_v43  ;;  %v517_v56 = vsel %vm515_vm5, %v516_v1, %v514_v25  ;;  %v519_v58 = vmul.f32 %v1177_v16, %v1975_v27  ;;  %vm541_vm12 = vcmp.eq.f32.partialorder %v1986_v6, inf  ;;  %1184 = vrsqrt.f32 %v2042_v31 }
  0x8b   : > { %930 = vst [vmem:[%s1652_s17 + $0xc8] sm:$0xff] %v866_v57  ;;  %v803_v45 = vadd.f32 %v517_v56, %v1903_v42  ;;  %v526_v61 = vmul.f32 %v1179_v55, %v1980_v33  ;;  %vm543_vm13 = vcmp.eq.f32.partialorder %v1986_v6, 0.0  ;;  %v2065_v62 = vadd.f32 4.0, %v234_v53 }
  0x8c   : > { %v1181_v23 = vpop.eup %1180  ;;  %v521_v4 = vsel %vm520_vm6, %v1975_v27, %v519_v58  ;;  %v544_v5 = vand.u32 2147483648, %v1986_v6  ;;  %1186 = vrsqrt.f32 %v2044_v9  ;;  %v235_v42 = vmul.f32 %v2053_v54, %v2053_v54  ;;  %v2175_v58 = vld [vmem:[%s1473_s30 + $0x140] sm:$0xff] }
  0x8d   : > { %v1183_v11 = vpop.eup %1182  ;;  %v867_v13 = vmul.f32 0.5, %v803_v45  ;;  %v524_v20 = vsel %vm522_vm7, %v523_v26, %v521_v4  ;;  %v528_v22 = vsel %vm527_vm8, %v1980_v33, %v526_v61  ;;  %v533_v14 = vmul.f32 %v1181_v23, %v1982_v15  ;;  %v2184_v61 = vld [vmem:[%s1473_s30 + $0x148] sm:$0xff] }
  0x8e   : > { %v804_v0 = vadd.f32 %v524_v20, %v1930_v7  ;;  %v531_v21 = vsel %vm529_vm9, %v530_v29, %v528_v22  ;;  %v540_v32 = vmul.f32 %v1183_v11, %v1986_v6  ;;  %v236_v18 = vmul.f32 %v2068_v24, %v2068_v24  ;;  %v2200_v20 = vld [vmem:[%s1473_s30 + $0x158] sm:$0xff] }
  0x8f   : > { %931 = vst [vmem:[%s1652_s17 + $0xd0] sm:$0xff] %v867_v13  ;;  %v805_v27 = vadd.f32 %v531_v21, %v1933_v48  ;;  %v535_v12 = vsel %vm534_vm10, %v1982_v15, %v533_v14  ;;  %1188 = vrsqrt.f32 %v2065_v62  ;;  %vm548_vm14 = vcmp.eq.f32.partialorder %v2042_v31, inf  ;;  %v2105_v48 = vld [vmem:[%s1473_s30 + $0x128] sm:$0xff] }
  0x90   : > { %v868_v7 = vmul.f32 0.5, %v804_v0  ;;  %v538_v33 = vsel %vm536_vm11, %v537_v35, %v535_v12  ;;  %v542_v59 = vsel %vm541_vm12, %v1986_v6, %v540_v32  ;;  %vm550_vm15 = vcmp.eq.f32.partialorder %v2042_v31, 0.0 }
  0x91   : > { %v869_v1 = vmul.f32 0.5, %v805_v27  ;;  %v806_v49 = vadd.f32 %v538_v33, %v1940_v17  ;;  %v545_v36 = vsel %vm543_vm13, %v544_v5, %v542_v59  ;;  %v2116_v44 = vadd.f32 4.0, %v235_v42 }
  0x92   : > { %932 = vst [vmem:[%s1652_s17 + $0xd8] sm:$0xff] %v868_v7  ;;  %v807_v15 = vadd.f32 %v545_v36, %v1943_v10  ;;  %v2118_v19 = vadd.f32 4.0, %v236_v18  ;;  %v237_v26 = vmul.f32 %v2096_v34, %v2096_v34  ;;  %v551_v6 = vand.u32 2147483648, %v2042_v31 }
  0x93   : > { %933 = vst [vmem:[%s1652_s17 + $0xe0] sm:$0xff] %v869_v1  ;;  %v870_v17 = vmul.f32 0.5, %v806_v49  ;;  %v238_v2 = vmul.f32 %v2105_v48, %v2105_v48  ;;  %v239_v10 = vmul.f32 %v2108_v30, %v2108_v30  ;;  %vm555_vm0 = vcmp.eq.f32.partialorder %v2044_v9, inf }
  0x94   : > { %v1185_v60 = vpop.eup %1184  ;;  %v871_v41 = vmul.f32 0.5, %v807_v15  ;;  %vm557_vm1 = vcmp.eq.f32.partialorder %v2044_v9, 0.0  ;;  %1190 = vrsqrt.f32 %v2116_v44  ;;  %v558_v29 = vand.u32 2147483648, %v2044_v9 }
  0x95   : > { %934 = vst [vmem:[%s1652_s17 + $0xe8] sm:$0xff] %v870_v17  ;;  %v547_v52 = vmul.f32 %v1185_v60, %v2042_v31  ;;  %1192 = vrsqrt.f32 %v2118_v19  ;;  %v240_v28 = vmul.f32 %v2123_v8, %v2123_v8  ;;  %vm562_vm2 = vcmp.eq.f32.partialorder %v2065_v62, inf }
  0x96   : > { %v1187_v46 = vpop.eup %1186  ;;  %935 = vst [vmem:[%s1652_s17 + $0xf0] sm:$0xff] %v871_v41  ;;  %vm564_vm3 = vcmp.eq.f32.partialorder %v2065_v62, 0.0  ;;  %v2143_v63 = vadd.f32 4.0, %v237_v26  ;;  %v2145_v50 = vadd.f32 4.0, %v238_v2  ;;  %v565_v51 = vand.u32 2147483648, %v2065_v62  ;;  %v2246_v41 = vld [vmem:[%s1473_s30 + $0x160] sm:$0xff] }
  0x97   : > { %v549_v3 = vsel %vm548_vm14, %v2042_v31, %v547_v52  ;;  %v554_v47 = vmul.f32 %v1187_v46, %v2044_v9  ;;  %v2152_v37 = vadd.f32 4.0, %v239_v10  ;;  %vm569_vm4 = vcmp.eq.f32.partialorder %v2116_v44, inf }
  0x98   : > { %v552_v53 = vsel %vm550_vm15, %v551_v6, %v549_v3  ;;  %vm571_vm5 = vcmp.eq.f32.partialorder %v2116_v44, 0.0  ;;  %1194 = vrsqrt.f32 %v2143_v63  ;;  %v2164_v31 = vadd.f32 4.0, %v240_v28 }
  0x99   : > { %v1189_v43 = vpop.eup %1188  ;;  %v808_v16 = vadd.f32 %v552_v53, %v2008_v38  ;;  %v556_v57 = vsel %vm555_vm0, %v2044_v9, %v554_v47  ;;  %1196 = vrsqrt.f32 %v2145_v50  ;;  %v572_v55 = vand.u32 2147483648, %v2116_v44 }
  0x9a   : > { %v559_v25 = vsel %vm557_vm1, %v558_v29, %v556_v57  ;;  %v561_v35 = vmul.f32 %v1189_v43, %v2065_v62  ;;  %vm576_vm6 = vcmp.eq.f32.partialorder %v2118_v19, inf  ;;  %vm578_vm7 = vcmp.eq.f32.partialorder %v2118_v19, 0.0  ;;  %v2272_v57 = vld [vmem:[%s1473_s30 + $0x168] sm:$0xff] }
  0x9b   : > { %v872_v38 = vmul.f32 0.5, %v808_v16  ;;  %v809_v56 = vadd.f32 %v559_v25, %v2011_v39  ;;  %1198 = vrsqrt.f32 %v2152_v37  ;;  %v579_v45 = vand.u32 2147483648, %v2118_v19  ;;  %v2187_v39 = vld [vmem:[%s1473_s30 + $0x150] sm:$0xff] }
  0x9c   : > { %v563_v9 = vsel %vm562_vm2, %v2065_v62, %v561_v35  ;;  %vm583_vm8 = vcmp.eq.f32.partialorder %v2143_v63, inf  ;;  %vm585_vm9 = vcmp.eq.f32.partialorder %v2143_v63, 0.0  ;;  %v586_v5 = vand.u32 2147483648, %v2143_v63 }
  0x9d   : > { %936 = vst [vmem:[%s1652_s17 + $0xf8] sm:$0xff] %v872_v38  ;;  %v873_v23 = vmul.f32 0.5, %v809_v56  ;;  %v566_v4 = vsel %vm564_vm3, %v565_v51, %v563_v9  ;;  %1200 = vrsqrt.f32 %v2164_v31  ;;  %vm590_vm10 = vcmp.eq.f32.partialorder %v2145_v50, inf  ;;  %v2283_v38 = vld [vmem:[%s1473_s30 + $0x178] sm:$0xff] }
  0x9e   : > { %v1191_v42 = vpop.eup %1190  ;;  %v810_v11 = vadd.f32 %v566_v4, %v2021_v40  ;;  %vm592_vm11 = vcmp.eq.f32.partialorder %v2145_v50, 0.0  ;;  %v241_v13 = vmul.f32 %v2175_v58, %v2175_v58  ;;  %v593_v14 = vand.u32 2147483648, %v2145_v50 }
  0x9f   : > { %v1193_v22 = vpop.eup %1192  ;;  %937 = vst [vmem:[%s1652_s17 + $0x100] sm:$0xff] %v873_v23  ;;  %v568_v62 = vmul.f32 %v1191_v42, %v2116_v44  ;;  %v242_v0 = vmul.f32 %v2184_v61, %v2184_v61  ;;  %v243_v40 = vmul.f32 %v2187_v39, %v2187_v39  ;;  %vm597_vm12 = vcmp.eq.f32.partialorder %v2152_v37, inf }
  0xa0   : > { %v874_v21 = vmul.f32 0.5, %v810_v11  ;;  %v575_v32 = vmul.f32 %v1193_v22, %v2118_v19  ;;  %v2211_v18 = vadd.f32 4.0, %v241_v13  ;;  %vm599_vm13 = vcmp.eq.f32.partialorder %v2152_v37, 0.0 }
  0xa1   : > { %v570_v27 = vsel %vm569_vm4, %v2116_v44, %v568_v62  ;;  %v2217_v12 = vadd.f32 4.0, %v242_v0  ;;  %v244_v7 = vmul.f32 %v2200_v20, %v2200_v20  ;;  %v600_v49 = vand.u32 2147483648, %v2152_v37 }
  0xa2   : > { %v1195_v33 = vpop.eup %1194  ;;  %938 = vst [vmem:[%s1652_s17 + $0x108] sm:$0xff] %v874_v21  ;;  %v573_v59 = vsel %vm571_vm5, %v572_v55, %v570_v27  ;;  %v577_v1 = vsel %vm576_vm6, %v2118_v19, %v575_v32  ;;  %1202 = vrsqrt.f32 %v2211_v18  ;;  %v2233_v6 = vadd.f32 4.0, %v243_v40  ;;  %v2280_v55 = vld [vmem:[%s1473_s30 + $0x170] sm:$0xff] }
  0xa3   : > { %v1197_v36 = vpop.eup %1196  ;;  %v811_v15 = vadd.f32 %v573_v59, %v2053_v54  ;;  %v580_v26 = vsel %vm578_vm7, %v579_v45, %v577_v1  ;;  %v582_v17 = vmul.f32 %v1195_v33, %v2143_v63  ;;  %vm604_vm14 = vcmp.eq.f32.partialorder %v2164_v31, inf }
  0xa4   : > { %v812_v44 = vadd.f32 %v580_v26, %v2068_v24  ;;  %v589_v2 = vmul.f32 %v1197_v36, %v2145_v50  ;;  %1204 = vrsqrt.f32 %v2217_v12  ;;  %vm606_vm15 = vcmp.eq.f32.partialorder %v2164_v31, 0.0 }
  0xa5   : > { %v1199_v10 = vpop.eup %1198  ;;  %v875_v60 = vmul.f32 0.5, %v811_v15  ;;  %v584_v54 = vsel %vm583_vm8, %v2143_v63, %v582_v17  ;;  %v2243_v19 = vadd.f32 4.0, %v244_v7  ;;  %v607_v51 = vand.u32 2147483648, %v2164_v31 }
  0xa6   : > { %v876_v24 = vmul.f32 0.5, %v812_v44  ;;  %v587_v52 = vsel %vm585_vm9, %v586_v5, %v584_v54  ;;  %v591_v29 = vsel %vm590_vm10, %v2145_v50, %v589_v2  ;;  %v596_v28 = vmul.f32 %v1199_v10, %v2152_v37  ;;  %v2353_v10 = vld [vmem:[%s1473_s30 + $0x188] sm:$0xff] }
  0xa7   : > { %v1201_v46 = vpop.eup %1200  ;;  %939 = vst [vmem:[%s1652_s17 + $0x110] sm:$0xff] %v875_v60  ;;  %v813_v3 = vadd.f32 %v587_v52, %v2096_v34  ;;  %v594_v47 = vsel %vm592_vm11, %v593_v14, %v591_v29  ;;  %1206 = vrsqrt.f32 %v2233_v6  ;;  %v245_v34 = vmul.f32 %v2246_v41, %v2246_v41  ;;  %v2356_v60 = vld [vmem:[%s1473_s30 + $0x190] sm:$0xff]  ;;  %v2363_v52 = vld [vmem:[%s1473_s30 + $0x198] sm:$0xff] }
  0xa8   : > { %940 = vst [vmem:[%s1652_s17 + $0x118] sm:$0xff] %v876_v24  ;;  %v814_v63 = vadd.f32 %v594_v47, %v2105_v48  ;;  %v598_v53 = vsel %vm597_vm12, %v2152_v37, %v596_v28  ;;  %v603_v43 = vmul.f32 %v1201_v46, %v2164_v31  ;;  %vm611_vm0 = vcmp.eq.f32.partialorder %v2211_v18, inf }
  0xa9   : > { %v877_v50 = vmul.f32 0.5, %v813_v3  ;;  %v601_v16 = vsel %vm599_vm13, %v600_v49, %v598_v53  ;;  %1208 = vrsqrt.f32 %v2243_v19  ;;  %vm613_vm1 = vcmp.eq.f32.partialorder %v2211_v18, 0.0 }
  0xaa   : > { %v878_v48 = vmul.f32 0.5, %v814_v63  ;;  %v815_v25 = vadd.f32 %v601_v16, %v2108_v30  ;;  %v605_v35 = vsel %vm604_vm14, %v2164_v31, %v603_v43  ;;  %v614_v56 = vand.u32 2147483648, %v2211_v18  ;;  %v2292_v30 = vld [vmem:[%s1473_s30 + $0x180] sm:$0xff] }
  0xab   : > { %941 = vst [vmem:[%s1652_s17 + $0x120] sm:$0xff] %v877_v50  ;;  %v608_v37 = vsel %vm606_vm15, %v607_v51, %v605_v35  ;;  %vm618_vm2 = vcmp.eq.f32.partialorder %v2217_v12, inf  ;;  %v2296_v4 = vadd.f32 4.0, %v245_v34  ;;  %v246_v31 = vmul.f32 %v2272_v57, %v2272_v57  ;;  %v2379_v51 = vld [vmem:[%s1473_s30 + $0x1a0] sm:$0xff] }
  0xac   : > { %v1203_v9 = vpop.eup %1202  ;;  %942 = vst [vmem:[%s1652_s17 + $0x128] sm:$0xff] %v878_v48  ;;  %v879_v45 = vmul.f32 0.5, %v815_v25  ;;  %v816_v23 = vadd.f32 %v608_v37, %v2123_v8  ;;  %vm620_vm3 = vcmp.eq.f32.partialorder %v2217_v12, 0.0  ;;  %v247_v42 = vmul.f32 %v2280_v55, %v2280_v55 }
  0xad   : > { %v610_v5 = vmul.f32 %v1203_v9, %v2211_v18  ;;  %v248_v11 = vmul.f32 %v2283_v38, %v2283_v38  ;;  %v621_v8 = vand.u32 2147483648, %v2217_v12  ;;  %1210 = vrsqrt.f32 %v2296_v4 }
  0xae   : > { %v1205_v13 = vpop.eup %1204  ;;  %943 = vst [vmem:[%s1652_s17 + $0x130] sm:$0xff] %v879_v45  ;;  %v880_v22 = vmul.f32 0.5, %v816_v23  ;;  %v249_v62 = vmul.f32 %v2292_v30, %v2292_v30  ;;  %vm625_vm4 = vcmp.eq.f32.partialorder %v2233_v6, inf  ;;  %v2316_v40 = vadd.f32 4.0, %v246_v31  ;;  %v2411_v31 = vld [vmem:[%s1473_s30 + $0x1a8] sm:$0xff] }
  0xaf   : > { %v612_v14 = vsel %vm611_vm0, %v2211_v18, %v610_v5  ;;  %v617_v0 = vmul.f32 %v1205_v13, %v2217_v12  ;;  %vm627_vm5 = vcmp.eq.f32.partialorder %v2233_v6, 0.0  ;;  %v2322_v32 = vadd.f32 4.0, %v247_v42 }
  0xb0   : > { %944 = vst [vmem:[%s1652_s17 + $0x138] sm:$0xff] %v880_v22  ;;  %v615_v21 = vsel %vm613_vm1, %v614_v56, %v612_v14  ;;  %v2324_v27 = vadd.f32 4.0, %v248_v11  ;;  %v628_v1 = vand.u32 2147483648, %v2233_v6  ;;  %1212 = vrsqrt.f32 %v2316_v40  ;;  %v2420_v11 = vld [vmem:[%s1473_s30 + $0x1b0] sm:$0xff] }
  0xb1   : > { %v1207_v7 = vpop.eup %1206  ;;  %v817_v33 = vadd.f32 %v615_v21, %v2175_v58  ;;  %v619_v59 = vsel %vm618_vm2, %v2217_v12, %v617_v0  ;;  %vm632_vm6 = vcmp.eq.f32.partialorder %v2243_v19, inf  ;;  %v2336_v36 = vadd.f32 4.0, %v249_v62 }
  0xb2   : > { %v622_v18 = vsel %vm620_vm3, %v621_v8, %v619_v59  ;;  %v624_v49 = vmul.f32 %v1207_v7, %v2233_v6  ;;  %vm634_vm7 = vcmp.eq.f32.partialorder %v2243_v19, 0.0  ;;  %1214 = vrsqrt.f32 %v2322_v32 }
  0xb3   : > { %v881_v58 = vmul.f32 0.5, %v817_v33  ;;  %v818_v15 = vadd.f32 %v622_v18, %v2184_v61  ;;  %v1209_v26 = vpop.eup %1208  ;;  %v635_v17 = vand.u32 2147483648, %v2243_v19  ;;  %vm639_vm8 = vcmp.eq.f32.partialorder %v2296_v4, inf }
  0xb4   : > { %v626_v12 = vsel %vm625_vm4, %v2233_v6, %v624_v49  ;;  %1216 = vrsqrt.f32 %v2324_v27  ;;  %v631_v2 = vmul.f32 %v1209_v26, %v2243_v19  ;;  %vm641_vm9 = vcmp.eq.f32.partialorder %v2296_v4, 0.0  ;;  %v2456_v26 = vld [vmem:[%s1473_s30 + $0x1c0] sm:$0xff] }
  0xb5   : > { %945 = vst [vmem:[%s1652_s17 + $0x140] sm:$0xff] %v881_v58  ;;  %v882_v44 = vmul.f32 0.5, %v818_v15  ;;  %v629_v61 = vsel %vm627_vm5, %v628_v1, %v626_v12  ;;  %v642_v24 = vand.u32 2147483648, %v2296_v4  ;;  %vm646_vm10 = vcmp.eq.f32.partialorder %v2316_v40, inf  ;;  %v2453_v15 = vld [vmem:[%s1473_s30 + $0x1b8] sm:$0xff]  ;;  %v2464_v12 = vld [vmem:[%s1473_s30 + $0x1c8] sm:$0xff] }
  0xb6   : > { %v819_v54 = vadd.f32 %v629_v61, %v2187_v39  ;;  %1218 = vrsqrt.f32 %v2336_v36  ;;  %v633_v6 = vsel %vm632_vm6, %v2243_v19, %v631_v2  ;;  %vm648_vm11 = vcmp.eq.f32.partialorder %v2316_v40, 0.0 }
  0xb7   : > { %946 = vst [vmem:[%s1652_s17 + $0x148] sm:$0xff] %v882_v44  ;;  %v649_v29 = vand.u32 2147483648, %v2316_v40  ;;  %vm653_vm12 = vcmp.eq.f32.partialorder %v2322_v32, inf  ;;  %v1211_v39 = vpop.eup %1210  ;;  %v636_v46 = vsel %vm634_vm7, %v635_v17, %v633_v6  ;;  %v250_v3 = vmul.f32 %v2353_v10, %v2353_v10 }
  0xb8   : > { %v883_v28 = vmul.f32 0.5, %v819_v54  ;;  %v251_v47 = vmul.f32 %v2356_v60, %v2356_v60  ;;  %v820_v63 = vadd.f32 %v636_v46, %v2200_v20  ;;  %v638_v53 = vmul.f32 %v1211_v39, %v2296_v4 }
  0xb9   : > { %vm655_vm13 = vcmp.eq.f32.partialorder %v2322_v32, 0.0  ;;  %v252_v43 = vmul.f32 %v2363_v52, %v2363_v52  ;;  %v656_v19 = vand.u32 2147483648, %v2322_v32  ;;  %vm660_vm14 = vcmp.eq.f32.partialorder %v2324_v27, inf }
  0xba   : > { %947 = vst [vmem:[%s1652_s17 + $0x150] sm:$0xff] %v883_v28  ;;  %v2389_v34 = vadd.f32 4.0, %v250_v3  ;;  %v2391_v50 = vadd.f32 4.0, %v251_v47  ;;  %v1213_v16 = vpop.eup %1212  ;;  %v884_v20 = vmul.f32 0.5, %v820_v63  ;;  %v640_v48 = vsel %vm639_vm8, %v2296_v4, %v638_v53 }
  0xbb   : > { %vm662_vm15 = vcmp.eq.f32.partialorder %v2324_v27, 0.0  ;;  %v253_v25 = vmul.f32 %v2379_v51, %v2379_v51  ;;  %v643_v35 = vsel %vm641_vm9, %v642_v24, %v640_v48  ;;  %v645_v37 = vmul.f32 %v1213_v16, %v2316_v40 }
  0xbc   : > { %1220 = vrsqrt.f32 %v2389_v34  ;;  %v2403_v56 = vadd.f32 4.0, %v252_v43  ;;  %v1215_v9 = vpop.eup %1214  ;;  %948 = vst [vmem:[%s1652_s17 + $0x158] sm:$0xff] %v884_v20  ;;  %v821_v45 = vadd.f32 %v643_v35, %v2246_v41  ;;  %v663_v23 = vand.u32 2147483648, %v2324_v27  ;;  %v2504_v20 = vld [vmem:[%s1473_s30 + $0x1d0] sm:$0xff] }
  0xbd   : > { %vm667_vm0 = vcmp.eq.f32.partialorder %v2336_v36, inf  ;;  %1222 = vrsqrt.f32 %v2391_v50  ;;  %v647_v5 = vsel %vm646_vm10, %v2316_v40, %v645_v37  ;;  %v652_v42 = vmul.f32 %v1215_v9, %v2322_v32 }
  0xbe   : > { %v1217_v4 = vpop.eup %1216  ;;  %vm669_vm1 = vcmp.eq.f32.partialorder %v2336_v36, 0.0  ;;  %v670_v41 = vand.u32 2147483648, %v2336_v36  ;;  %v885_v13 = vmul.f32 0.5, %v821_v45  ;;  %v650_v22 = vsel %vm648_vm11, %v649_v29, %v647_v5 }
  0xbf   : > { %v659_v8 = vmul.f32 %v1217_v4, %v2324_v27  ;;  %v2425_v62 = vadd.f32 4.0, %v253_v25  ;;  %v822_v0 = vadd.f32 %v650_v22, %v2272_v57  ;;  %v654_v21 = vsel %vm653_vm12, %v2322_v32, %v652_v42  ;;  %v2525_v42 = vld [vmem:[%s1473_s30 + $0x1d8] sm:$0xff]  ;;  %v2533_v22 = vld [vmem:[%s1473_s30 + $0x1e0] sm:$0xff] }
  0xc0   : > { %v1219_v14 = vpop.eup %1218  ;;  %1224 = vrsqrt.f32 %v2403_v56  ;;  %v254_v40 = vmul.f32 %v2411_v31, %v2411_v31  ;;  %949 = vst [vmem:[%s1652_s17 + $0x160] sm:$0xff] %v885_v13  ;;  %v657_v7 = vsel %vm655_vm13, %v656_v19, %v654_v21  ;;  %v255_v59 = vmul.f32 %v2420_v11, %v2420_v11 }
  0xc1   : > { %v661_v57 = vsel %vm660_vm14, %v2324_v27, %v659_v8  ;;  %v666_v33 = vmul.f32 %v1219_v14, %v2336_v36  ;;  %v886_v1 = vmul.f32 0.5, %v822_v0  ;;  %v823_v18 = vadd.f32 %v657_v7, %v2280_v55  ;;  %v2536_v8 = vld [vmem:[%s1473_s30 + $0x1e8] sm:$0xff] }
  0xc2   : > { %v664_v49 = vsel %vm662_vm15, %v663_v23, %v661_v57  ;;  %vm674_vm2 = vcmp.eq.f32.partialorder %v2389_v34, inf  ;;  %1226 = vrsqrt.f32 %v2425_v62  ;;  %vm676_vm3 = vcmp.eq.f32.partialorder %v2389_v34, 0.0 }
  0xc3   : > { %v824_v58 = vadd.f32 %v664_v49, %v2283_v38  ;;  %v668_v32 = vsel %vm667_vm0, %v2336_v36, %v666_v33  ;;  %950 = vst [vmem:[%s1652_s17 + $0x168] sm:$0xff] %v886_v1  ;;  %v887_v55 = vmul.f32 0.5, %v823_v18  ;;  %v677_v38 = vand.u32 2147483648, %v2389_v34 }
  0xc4   : > { %v671_v27 = vsel %vm669_vm1, %v670_v41, %v668_v32  ;;  %v2467_v61 = vadd.f32 4.0, %v254_v40  ;;  %v2469_v2 = vadd.f32 4.0, %v255_v59  ;;  %vm681_vm4 = vcmp.eq.f32.partialorder %v2391_v50, inf }
  0xc5   : > { %v888_v17 = vmul.f32 0.5, %v824_v58  ;;  %v825_v44 = vadd.f32 %v671_v27, %v2292_v30  ;;  %951 = vst [vmem:[%s1652_s17 + $0x170] sm:$0xff] %v887_v55  ;;  %v684_v36 = vand.u32 2147483648, %v2391_v50  ;;  %v256_v24 = vmul.f32 %v2453_v15, %v2453_v15 }
  0xc6   : > { %v1221_v54 = vpop.eup %1220  ;;  %v257_v6 = vmul.f32 %v2456_v26, %v2456_v26  ;;  %1228 = vrsqrt.f32 %v2467_v61  ;;  %v258_v28 = vmul.f32 %v2464_v12, %v2464_v12  ;;  %vm683_vm5 = vcmp.eq.f32.partialorder %v2391_v50, 0.0 }
  0xc7   : > { %v1223_v29 = vpop.eup %1222  ;;  %952 = vst [vmem:[%s1652_s17 + $0x178] sm:$0xff] %v888_v17  ;;  %v889_v30 = vmul.f32 0.5, %v825_v44  ;;  %v673_v39 = vmul.f32 %v1221_v54, %v2389_v34  ;;  %vm688_vm6 = vcmp.eq.f32.partialorder %v2403_v56, inf  ;;  %1230 = vrsqrt.f32 %v2469_v2 }
  0xc8   : > { %v680_v46 = vmul.f32 %v1223_v29, %v2391_v50  ;;  %vm690_vm7 = vcmp.eq.f32.partialorder %v2403_v56, 0.0  ;;  %v691_v47 = vand.u32 2147483648, %v2403_v56  ;;  %vm695_vm8 = vcmp.eq.f32.partialorder %v2425_v62, inf }
  0xc9   : > { %953 = vst [vmem:[%s1652_s17 + $0x180] sm:$0xff] %v889_v30  ;;  %v675_v3 = vsel %vm674_vm2, %v2389_v34, %v673_v39  ;;  %v2499_v19 = vadd.f32 4.0, %v256_v24  ;;  %v2501_v16 = vadd.f32 4.0, %v257_v6  ;;  %v2508_v37 = vadd.f32 4.0, %v258_v28 }
  0xca   : > { %v1225_v63 = vpop.eup %1224  ;;  %v678_v53 = vsel %vm676_vm3, %v677_v38, %v675_v3  ;;  %v682_v43 = vsel %vm681_vm4, %v2391_v50, %v680_v46  ;;  %vm697_vm9 = vcmp.eq.f32.partialorder %v2425_v62, 0.0  ;;  %v698_v50 = vand.u32 2147483648, %v2425_v62  ;;  %v2596_v46 = vld [vmem:[%s1473_s30 + $0x1f0] sm:$0xff] }
  0xcb   : > { %v826_v48 = vadd.f32 %v678_v53, %v2353_v10  ;;  %v685_v25 = vsel %vm683_vm5, %v684_v36, %v682_v43  ;;  %v687_v35 = vmul.f32 %v1225_v63, %v2403_v56  ;;  %1232 = vrsqrt.f32 %v2499_v19  ;;  %v2607_v53 = vld [vmem:[%s1473_s30 + $0x1f8] sm:$0xff] }
  0xcc   : > { %v827_v34 = vadd.f32 %v685_v25, %v2356_v60  ;;  %v1227_v9 = vpop.eup %1226  ;;  %1234 = vrsqrt.f32 %v2501_v16  ;;  %v259_v60 = vmul.f32 %v2504_v20, %v2504_v20  ;;  %vm702_vm10 = vcmp.eq.f32.partialorder %v2467_v61, inf }
  0xcd   : > { %v890_v45 = vmul.f32 0.5, %v826_v48  ;;  %v689_v10 = vsel %vm688_vm6, %v2403_v56, %v687_v35  ;;  %v694_v5 = vmul.f32 %v1227_v9, %v2425_v62  ;;  %vm704_vm11 = vcmp.eq.f32.partialorder %v2467_v61, 0.0 }
  0xce   : > { %v891_v23 = vmul.f32 0.5, %v827_v34  ;;  %v692_v4 = vsel %vm690_vm7, %v691_v47, %v689_v10  ;;  %v705_v13 = vand.u32 2147483648, %v2467_v61  ;;  %1236 = vrsqrt.f32 %v2508_v37 }
  0xcf   : > { %954 = vst [vmem:[%s1652_s17 + $0x188] sm:$0xff] %v890_v45  ;;  %v828_v41 = vadd.f32 %v692_v4, %v2363_v52  ;;  %v696_v56 = vsel %vm695_vm8, %v2425_v62, %v694_v5  ;;  %vm709_vm12 = vcmp.eq.f32.partialorder %v2469_v2, inf  ;;  %vm711_vm13 = vcmp.eq.f32.partialorder %v2469_v2, 0.0 }
  0xd0   : > { %955 = vst [vmem:[%s1652_s17 + $0x190] sm:$0xff] %v891_v23  ;;  %v712_v52 = vand.u32 2147483648, %v2469_v2  ;;  %v1229_v14 = vpop.eup %1228  ;;  %v699_v21 = vsel %vm697_vm9, %v698_v50, %v696_v56  ;;  %v2547_v40 = vadd.f32 4.0, %v259_v60  ;;  %v260_v7 = vmul.f32 %v2525_v42, %v2525_v42 }
  0xd1   : > { %v892_v0 = vmul.f32 0.5, %v828_v41  ;;  %v1231_v57 = vpop.eup %1230  ;;  %v829_v33 = vadd.f32 %v699_v21, %v2379_v51  ;;  %v701_v59 = vmul.f32 %v1229_v14, %v2467_v61  ;;  %v261_v1 = vmul.f32 %v2533_v22, %v2533_v22 }
  0xd2   : > { %v262_v18 = vmul.f32 %v2536_v8, %v2536_v8  ;;  %v708_v62 = vmul.f32 %v1231_v57, %v2469_v2  ;;  %vm716_vm14 = vcmp.eq.f32.partialorder %v2499_v19, inf  ;;  %vm718_vm15 = vcmp.eq.f32.partialorder %v2499_v19, 0.0 }
  0xd3   : > { %956 = vst [vmem:[%s1652_s17 + $0x198] sm:$0xff] %v892_v0  ;;  %1238 = vrsqrt.f32 %v2547_v40  ;;  %v893_v49 = vmul.f32 0.5, %v829_v33  ;;  %v703_v51 = vsel %vm702_vm10, %v2467_v61, %v701_v59  ;;  %v719_v58 = vand.u32 2147483648, %v2499_v19 }
  0xd4   : > { %v2566_v32 = vadd.f32 4.0, %v260_v7  ;;  %v706_v55 = vsel %vm704_vm11, %v705_v13, %v703_v51  ;;  %v710_v27 = vsel %vm709_vm12, %v2469_v2, %v708_v62  ;;  %vm723_vm0 = vcmp.eq.f32.partialorder %v2501_v16, inf }
  0xd5   : > { %v2574_v38 = vadd.f32 4.0, %v261_v1  ;;  %v1233_v17 = vpop.eup %1232  ;;  %957 = vst [vmem:[%s1652_s17 + $0x1a0] sm:$0xff] %v893_v49  ;;  %v830_v44 = vadd.f32 %v706_v55, %v2411_v31  ;;  %v713_v54 = vsel %vm711_vm13, %v712_v52, %v710_v27  ;;  %v2581_v61 = vadd.f32 4.0, %v262_v18 }
  0xd6   : > { %1240 = vrsqrt.f32 %v2566_v32  ;;  %v1235_v36 = vpop.eup %1234  ;;  %v831_v24 = vadd.f32 %v713_v54, %v2420_v11  ;;  %v715_v6 = vmul.f32 %v1233_v17, %v2499_v19  ;;  %vm725_vm1 = vcmp.eq.f32.partialorder %v2501_v16, 0.0 }
  0xd7   : > { %v726_v29 = vand.u32 2147483648, %v2501_v16  ;;  %v894_v31 = vmul.f32 0.5, %v830_v44  ;;  %v722_v2 = vmul.f32 %v1235_v36, %v2501_v16  ;;  %vm730_vm2 = vcmp.eq.f32.partialorder %v2508_v37, inf }
  0xd8   : > { %1242 = vrsqrt.f32 %v2574_v38  ;;  %v1237_v30 = vpop.eup %1236  ;;  %v895_v39 = vmul.f32 0.5, %v831_v24  ;;  %v717_v11 = vsel %vm716_vm14, %v2499_v19, %v715_v6  ;;  %vm732_vm3 = vcmp.eq.f32.partialorder %v2508_v37, 0.0 }
  0xd9   : > { %v733_v28 = vand.u32 2147483648, %v2508_v37  ;;  %958 = vst [vmem:[%s1652_s17 + $0x1a8] sm:$0xff] %v894_v31  ;;  %v720_v3 = vsel %vm718_vm15, %v719_v58, %v717_v11  ;;  %v724_v47 = vsel %vm723_vm0, %v2501_v16, %v722_v2  ;;  %v729_v63 = vmul.f32 %v1237_v30, %v2508_v37 }
  0xda   : > { %1244 = vrsqrt.f32 %v2581_v61  ;;  %959 = vst [vmem:[%s1652_s17 + $0x1b0] sm:$0xff] %v895_v39  ;;  %v832_v43 = vadd.f32 %v720_v3, %v2453_v15  ;;  %v727_v48 = vsel %vm725_vm1, %v726_v29, %v724_v47  ;;  %vm737_vm4 = vcmp.eq.f32.partialorder %v2547_v40, inf }
  0xdb   : > { %v833_v19 = vadd.f32 %v727_v48, %v2456_v26  ;;  %v731_v25 = vsel %vm730_vm2, %v2508_v37, %v729_v63  ;;  %vm739_vm5 = vcmp.eq.f32.partialorder %v2547_v40, 0.0  ;;  %v263_v35 = vmul.f32 %v2596_v46, %v2596_v46 }
  0xdc   : > { %v896_v15 = vmul.f32 0.5, %v832_v43  ;;  %v734_v16 = vsel %vm732_vm3, %v733_v28, %v731_v25  ;;  %v740_v50 = vand.u32 2147483648, %v2547_v40  ;;  %v264_v26 = vmul.f32 %v2607_v53, %v2607_v53 }
  0xdd   : > { %v1239_v34 = vpop.eup %1238  ;;  %v897_v9 = vmul.f32 0.5, %v833_v19  ;;  %v834_v45 = vadd.f32 %v734_v16, %v2464_v12  ;;  %v327_v60 = vadd.f32 4.0, %v263_v35  ;;  %vm744_vm6 = vcmp.eq.f32.partialorder %v2566_v32, inf }
  0xde   : > { %v736_v10 = vmul.f32 %v1239_v34, %v2547_v40  ;;  %960 = vst [vmem:[%s1652_s17 + $0x1b8] sm:$0xff] %v896_v15  ;;  %v328_v23 = vadd.f32 4.0, %v264_v26  ;;  %v747_v41 = vand.u32 2147483648, %v2566_v32  ;;  %vm746_vm7 = vcmp.eq.f32.partialorder %v2566_v32, 0.0 }
  0xdf   : > { %961 = vst [vmem:[%s1652_s17 + $0x1c0] sm:$0xff] %v897_v9  ;;  %v898_v37 = vmul.f32 0.5, %v834_v45  ;;  %1246 = vrsqrt.f32 %v327_v60  ;;  %vm751_vm8 = vcmp.eq.f32.partialorder %v2574_v38, inf  ;;  %v754_v14 = vand.u32 2147483648, %v2574_v38 }
  0xe0   : > { %v1241_v4 = vpop.eup %1240  ;;  %v738_v5 = vsel %vm737_vm4, %v2547_v40, %v736_v10  ;;  %1248 = vrsqrt.f32 %v328_v23  ;;  %vm753_vm9 = vcmp.eq.f32.partialorder %v2574_v38, 0.0  ;;  %vm758_vm10 = vcmp.eq.f32.partialorder %v2581_v61, inf }
  0xe1   : > { %v741_v12 = vsel %vm739_vm5, %v740_v50, %v738_v5  ;;  %v743_v13 = vmul.f32 %v1241_v4, %v2566_v32  ;;  %962 = vst [vmem:[%s1652_s17 + $0x1c8] sm:$0xff] %v898_v37  ;;  %vm760_vm11 = vcmp.eq.f32.partialorder %v2581_v61, 0.0  ;;  %vm765_vm12 = vcmp.eq.f32.partialorder %v327_v60, inf }
  0xe2   : > { %v1243_v56 = vpop.eup %1242  ;;  %v835_v52 = vadd.f32 %v741_v12, %v2504_v20  ;;  %v761_v20 = vand.u32 2147483648, %v2581_v61  ;;  %v768_v27 = vand.u32 2147483648, %v327_v60  ;;  %vm767_vm13 = vcmp.eq.f32.partialorder %v327_v60, 0.0 }
  0xe3   : > { %v745_v0 = vsel %vm744_vm6, %v2566_v32, %v743_v13  ;;  %v750_v21 = vmul.f32 %v1243_v56, %v2574_v38  ;;  %vm772_vm14 = vcmp.eq.f32.partialorder %v328_v23, inf  ;;  %vm774_vm15 = vcmp.eq.f32.partialorder %v328_v23, 0.0 }
  0xe4   : > { %v1245_v40 = vpop.eup %1244  ;;  %v899_v7 = vmul.f32 0.5, %v835_v52  ;;  %v748_v57 = vsel %vm746_vm7, %v747_v41, %v745_v0 }
  0xe5   : > { %v836_v33 = vadd.f32 %v748_v57, %v2525_v42  ;;  %v752_v59 = vsel %vm751_vm8, %v2574_v38, %v750_v21  ;;  %v757_v1 = vmul.f32 %v1245_v40, %v2581_v61 }
  0xe6   : > { %963 = vst [vmem:[%s1652_s17 + $0x1d0] sm:$0xff] %v899_v7  ;;  %v755_v18 = vsel %vm753_vm9, %v754_v14, %v752_v59 }
  0xe7   : > { %v900_v62 = vmul.f32 0.5, %v836_v33  ;;  %v837_v49 = vadd.f32 %v755_v18, %v2533_v22  ;;  %v759_v51 = vsel %vm758_vm10, %v2581_v61, %v757_v1  ;;  %v775_v22 = vand.u32 2147483648, %v328_v23 }
  0xe8   : > { %v762_v58 = vsel %vm760_vm11, %v761_v20, %v759_v51 }
  0xe9   : > { %964 = vst [vmem:[%s1652_s17 + $0x1d8] sm:$0xff] %v900_v62  ;;  %v901_v32 = vmul.f32 0.5, %v837_v49  ;;  %v838_v42 = vadd.f32 %v762_v58, %v2536_v8  ;;  %v1247_v55 = vpop.eup %1246 }
  0xea   : > { %v764_v17 = vmul.f32 %v1247_v55, %v327_v60  ;;  %v1249_v44 = vpop.eup %1248 }
  0xeb   : > { %965 = vst [vmem:[%s1652_s17 + $0x1e0] sm:$0xff] %v901_v32  ;;  %v902_v38 = vmul.f32 0.5, %v838_v42  ;;  %v771_v61 = vmul.f32 %v1249_v44, %v328_v23 }
  0xec   : > { %v766_v54 = vsel %vm765_vm12, %v327_v60, %v764_v17 }
  0xed   : > { %966 = vst [vmem:[%s1652_s17 + $0x1e8] sm:$0xff] %v902_v38  ;;  %v769_v8 = vsel %vm767_vm13, %v768_v27, %v766_v54  ;;  %v773_v24 = vsel %vm772_vm14, %v328_v23, %v771_v61 }
  0xee   : > { %v839_v36 = vadd.f32 %v769_v8, %v2596_v46  ;;  %v776_v6 = vsel %vm774_vm15, %v775_v22, %v773_v24 }
  0xef   : > { %v840_v31 = vadd.f32 %v776_v6, %v2607_v53 }
  0xf0   : > { %v903_v29 = vmul.f32 0.5, %v839_v36 }
  0xf1   : > { %v904_v2 = vmul.f32 0.5, %v840_v31 }
  0xf2   : > { %967 = vst [vmem:[%s1652_s17 + $0x1f0] sm:$0xff] %v903_v29 }
  0xf3   : > { %968 = vst [vmem:[%s1652_s17 + $0x1f8] sm:$0xff] %v904_v2 }
  0xf4   : > { %1293 = shalt.err (!%p1290_p1)
}
  0xf5   : > { %s1294_s13 = scalar_lea.hbm %s2668_s2, 8192  ;;  %s1298_s20 = scalar_lea.hbm %s2716_s1, 32768 }
  0xf6   : > { %p1295_p3 = scmp.ne.s32.totalorder %s2668_s2, %s1294_s13  ;;  %p1299_p0 = scmp.lt.u32.totalorder %s2668_s2, %s2716_s1 }
  0xf7   : > { %p1300_p2 = scmp.lt.u32.totalorder %s1298_s20, %s1294_s13  ;;  %p1302_p6 = scmp.lt.u32.totalorder %s1294_s13, %s2668_s2 }
  0xf8   : > { %p1296_p4 = pnand %p1295_p3, %p2724_p10 }
  0xf9   : > { %p1301_p7 = por %p1300_p2, %p1299_p0 }
  0xfa   : > { %p1297_p5 = pneg %p1296_p4 }
  0xfb   : > { %p1303_p11 = por %p1302_p6, %p1301_p7 }
  0xfd   : > { %p1304_p12 = pnand %p1303_p11, %p1297_p5 }
  0xff   : > { %1307 = shalt.err (!%p1304_p12)
}
 0x100   : > { %s1352_s24 = smov 128   ;;  %s1353_s26 = smov 8  }
 0x101   : > { %1074 = dma.vmem_to_hbm [thread:$0]  (%p2724_p10), %s2670_s27, 8192, %s2668_s2, %s970_s3, %s1352_s24, %s1352_s24, %s1353_s26  }
 0x102 PF: > { %p1085_p8 = scmp.ge.s32.totalorder %s1346_s9, 2  ;;  %s998_s30 = sand.u32 1, %s1334_s6  }
 0x103   : > { %p2725_p9 = scmp.ne.s32.totalorder %s2721_s19, 0  ;;  %s999_s17 = scalar_lea.sflag [#allocation4], %s998_s30 }
 0x105   : > { %p1081_p13 = pnand %p1085_p8, %p2725_p9 }
 0x107   : > { %1329 = dma.done.wait (!%p1081_p13), %s999_s17, 8192  }
 0x108   : > { %1331 = vsyncadd (!%p1081_p13), %s999_s17, 4294959104  ;;  %p14_p1 = scmp.ge.s32.totalorder %s1389_s12, 6   ;;  %s2726_s6 = smov %s1338_s7 }
 0x109   : > { %s2727_s7 = smov %s1342_s8  ;;  %s2728_s8 = smov %s1401_s15 }
 0x10a   : > { %s2729_s9 = smov %s1389_s12  ;;  %16 = sbr.rel (!%p14_p1) target bundleno = 5 (0x5), region = 69 }
 0x111   :  { %1004 = vsyncpa [#allocation3], 1 }
 0x112   :  { %1006 = vsyncpa [#allocation3 + $0x1], 1 }
 0x113   :  { %1007 = vsyncpa [#allocation4], 1 }
 0x114   :  { %1009 = vsyncpa [#allocation4 + $0x1], 1 }

</bundles_post_ra>
